<compile_context>
chip_gen: v7x
topology: tpu7x:2x2x1
jax: 0.10.0
libtpu: 0.0.40
codegen_flags: <defaults>
</compile_context>

<pallas_src>
import functools
import math

import jax
import jax.numpy as jnp
from jax import lax
from jax.experimental import pallas as pl
from jax.experimental.pallas import tpu as pltpu

LANE = 128


# ---------------------------------------------------------------------------
# helpers
# ---------------------------------------------------------------------------
def _round_up(x, m):
    return (x + m - 1) // m * m


# ---------------------------------------------------------------------------
# kernel 1: projection  support1 = X @ W1   (run exactly once, row-tiled)
# ---------------------------------------------------------------------------
def _project_kernel(x_ref, w_ref, out_ref):
    out_ref[...] = jnp.dot(
        x_ref[...], w_ref[...], preferred_element_type=jnp.float32
    ).astype(out_ref.dtype)


def _project(x, w_pad, *, tm):
    n, f_in = x.shape
    f_out = w_pad.shape[1]
    return pl.pallas_call(
        _project_kernel,
        out_shape=jax.ShapeDtypeStruct((n, f_out), jnp.bfloat16),
        grid_spec=pltpu.PrefetchScalarGridSpec(
            num_scalar_prefetch=0,
            grid=(n // tm,),
            in_specs=[
                pl.BlockSpec((tm, f_in), lambda i: (i, 0)),
                pl.BlockSpec((f_in, f_out), lambda i: (0, 0)),
            ],
            out_specs=pl.BlockSpec((tm, f_out), lambda i: (i, 0)),
        ),
        compiler_params=pltpu.CompilerParams(dimension_semantics=("parallel",)),
    )(x, w_pad)


# ---------------------------------------------------------------------------
# kernel 2: fused aggregation
#   acc  = adj @ support                         (bf16 x bf16 -> f32, tiled k)
#   h    = relu(acc + bias)                      (epilogue, k == last)
#   mode == "project": out = h @ W_next                       (-> bf16 support)
#   mode == "head":    out = log_softmax(h @ W_lin + b_lin)   (-> f32 logprobs)
# ---------------------------------------------------------------------------
def _agg_kernel(adj_ref, sup_ref, b_ref, w_ref, b2_ref, out_ref, acc_ref, *,
                mode, num_classes):
    k = pl.program_id(1)

    @pl.when(k == 0)
    def _():
        acc_ref[...] = jnp.zeros_like(acc_ref)

    # Native full-rate MXU mode on v5e/v6e/v7x: bf16 x bf16 with f32 accumulate.
    acc_ref[...] += jnp.dot(adj_ref[...], sup_ref[...],
                            preferred_element_type=jnp.float32)

    @pl.when(k == pl.num_programs(1) - 1)
    def _():
        h = jnp.maximum(acc_ref[...] + b_ref[...], 0.0)      # relu(adj@sup + b)
        y = jnp.dot(h, w_ref[...],
                    preferred_element_type=jnp.float32) + b2_ref[...]
        if mode == "head":
            # Mask padded class columns before log_softmax.
            col = lax.broadcasted_iota(jnp.int32, y.shape, 1)
            y = jnp.where(col < num_classes, y, -1e30)
            m = jnp.max(y, axis=-1, keepdims=True)
            s = y - m
            lse = jnp.log(jnp.sum(jnp.exp(s), axis=-1, keepdims=True))
            y = s - lse
        out_ref[...] = y.astype(out_ref.dtype)


def _aggregate_fused(adj_bf16, support, bias, w_next, b_next, *, tm, tk, mode,
                     num_classes=0, out_dtype=jnp.bfloat16):
    n = adj_bf16.shape[0]
    f_in = support.shape[1]
    f_out = w_next.shape[1]
    bias2d = bias.reshape(1, f_in).astype(jnp.float32)
    b2_2d = b_next.reshape(1, f_out).astype(jnp.float32)
    kernel = functools.partial(_agg_kernel, mode=mode, num_classes=num_classes)
    return pl.pallas_call(
        kernel,
        out_shape=jax.ShapeDtypeStruct((n, f_out), out_dtype),
        grid_spec=pltpu.PrefetchScalarGridSpec(
            num_scalar_prefetch=0,
            grid=(n // tm, n // tk),
            in_specs=[
                pl.BlockSpec((tm, tk), lambda i, k: (i, k)),       # adj (bf16)
                pl.BlockSpec((tk, f_in), lambda i, k: (k, 0)),     # support bf16
                pl.BlockSpec((1, f_in), lambda i, k: (0, 0)),      # layer bias
                pl.BlockSpec((f_in, f_out), lambda i, k: (0, 0)),  # fused weight
                pl.BlockSpec((1, f_out), lambda i, k: (0, 0)),     # fused bias
            ],
            out_specs=pl.BlockSpec((tm, f_out), lambda i, k: (i, 0)),
            scratch_shapes=[pltpu.VMEM((tm, f_in), jnp.float32)],
        ),
        compiler_params=pltpu.CompilerParams(
            dimension_semantics=("parallel", "arbitrary")),
    )(adj_bf16, support, bias2d, w_next, b2_2d)


# ---------------------------------------------------------------------------
# full GCN2Layer forward
# ---------------------------------------------------------------------------
def gcn2layer_forward(x, adj, gc1_params, gc2_params, lin_params):
    """Inference forward of GCN2Layer.

    gc1_params = (W1 [F_in, H], b1 [H]); gc2_params = (W2 [H, H], b2 [H]);
    lin_params = (Wlin [H, C], blin [C]).  Returns log-probs [N, C].
    """
    # TODO(synk): training-mode dropout (F.dropout) is omitted — eval forward
    # only; it would use pltpu.prng_seed + pltpu.stateful_bernoulli.
    w1, b1 = gc1_params
    w2, b2 = gc2_params
    wl, bl = lin_params

    n = x.shape[0]
    nhid = w1.shape[1]
    nclass = wl.shape[1]
    f_pad = _round_up(nhid, LANE)
    c_pad = _round_up(nclass, LANE)

    # Fixed 256-512 tiles; pad N up to a tile multiple (no full-N fallback, so
    # the grid always pipelines and the row axis can shard across TCs).
    t = min(512, _round_up(n, 2 * LANE))
    n_pad = _round_up(n, t)

    # Zero-pad node rows / adjacency: padded adjacency rows & columns are all
    # zero so padded nodes never contribute to real rows; sliced off at the end.
    x_p = jnp.pad(x, ((0, n_pad - n), (0, 0))).astype(jnp.float32)
    adj_bf16 = jnp.pad(adj, ((0, n_pad - n), (0, n_pad - n))).astype(jnp.bfloat16)
    # TODO(synk): per-target adjacency quantization (fp8 on v7x, int8 on
    # v5e/v6e with a folded scale) would halve the dominant HBM stream again.

    # Zero-pad parameters so every output is lane-dense (multiple of 128).
    w1_p = jnp.pad(w1, ((0, 0), (0, f_pad - nhid))).astype(jnp.float32)
    w2_p = jnp.pad(w2, ((0, f_pad - nhid), (0, f_pad - nhid))).astype(jnp.float32)
    wl_p = jnp.pad(wl, ((0, f_pad - nhid), (0, c_pad - nclass))).astype(jnp.float32)
    b1_p = jnp.pad(b1, (0, f_pad - nhid)).astype(jnp.float32)
    b2_p = jnp.pad(b2, (0, f_pad - nhid)).astype(jnp.float32)
    bl_p = jnp.pad(bl, (0, c_pad - nclass)).astype(jnp.float32)
    zero_b = jnp.zeros((f_pad,), jnp.float32)

    # support1 = x @ W1 (computed exactly once, streamed in bf16).
    support1 = _project(x_p, w1_p, tm=t)

    # Layer 1 aggregation fused with layer 2's projection:
    #   support2 = relu(adj @ support1 + b1) @ W2
    support2 = _aggregate_fused(adj_bf16, support1, b1_p, w2_p, zero_b,
                                tm=t, tk=t, mode="project",
                                out_dtype=jnp.bfloat16)

    # Layer 2 aggregation fused with linear head + log_softmax:
    #   out = log_softmax(relu(adj @ support2 + b2) @ Wl + bl)
    logp = _aggregate_fused(adj_bf16, support2, b2_p, wl_p, bl_p,
                            tm=t, tk=t, mode="head",
                            num_classes=nclass, out_dtype=jnp.float32)
    return logp[:n, :nclass]


# ---------------------------------------------------------------------------
# demo / correctness check
# ---------------------------------------------------------------------------
if __name__ == "__main__":
    # Small shapes consistent with the module: N nodes, nfeat -> nhid -> nclass.
    N, NFEAT, NHID, NCLASS = 256, 64, 32, 8

    key = jax.random.PRNGKey(0)
    kx, ka, kw1, kb1, kw2, kb2, kwl, kbl = jax.random.split(key, 8)

    # GraphConvolution.reset_parameters(): uniform(-stdv, stdv), stdv=1/sqrt(out).
    stdv = 1.0 / math.sqrt(NHID)
    w1 = jax.random.uniform(kw1, (NFEAT, NHID), jnp.float32, -stdv, stdv)
    b1 = jax.random.uniform(kb1, (NHID,), jnp.float32, -stdv, stdv)
    w2 = jax.random.uniform(kw2, (NHID, NHID), jnp.float32, -stdv, stdv)
    b2 = jax.random.uniform(kb2, (NHID,), jnp.float32, -stdv, stdv)
    # nn.Linear default init: uniform(-1/sqrt(fan_in), 1/sqrt(fan_in)).
    stdl = 1.0 / math.sqrt(NHID)
    wl = jax.random.uniform(kwl, (NHID, NCLASS), jnp.float32, -stdl, stdl)
    bl = jax.random.uniform(kbl, (NCLASS,), jnp.float32, -stdl, stdl)

    # Node features.
    x = jax.random.normal(kx, (N, NFEAT), jnp.float32)

    # Synthetic sparse-ish symmetric-normalized adjacency (dense storage;
    # torch.spmm result is identical to a dense matmul).
    a_raw = (jax.random.uniform(ka, (N, N)) < 0.1).astype(jnp.float32)
    a_sym = jnp.maximum(a_raw, a_raw.T) + jnp.eye(N, dtype=jnp.float32)
    deg = jnp.sum(a_sym, axis=1)
    dinv = 1.0 / jnp.sqrt(deg)
    adj = a_sym * dinv[:, None] * dinv[None, :]

    fwd = jax.jit(gcn2layer_forward)
    out = fwd(x, adj, (w1, b1), (w2, b2), (wl, bl))
    out = jax.block_until_ready(out)

    # Reference mirroring the kernel's bf16 quantization points
    # (bf16 adjacency and bf16 support streams; eval-mode dropout = identity).
    adj_q = adj.astype(jnp.bfloat16).astype(jnp.float32)
    s1 = (x @ w1).astype(jnp.bfloat16).astype(jnp.float32)
    h1 = jax.nn.relu(adj_q @ s1 + b1)
    s2 = (h1 @ w2).astype(jnp.bfloat16).astype(jnp.float32)
    h2 = jax.nn.relu(adj_q @ s2 + b2)
    ref = jax.nn.log_softmax(h2 @ wl + bl, axis=1)

    assert out.shape == (N, NCLASS)
    assert jnp.allclose(out, ref, atol=2e-2, rtol=2e-2), "mismatch vs reference"

    print("KERNEL_OK")
</pallas_src>

<mosaic_0001>
module attributes {stable_mosaic.version = 11 : i64} {
  func.func @_project_kernel(%arg0: i32, %arg1: memref<256x64xf32, #tpu.memory_space<vmem>>, %arg2: memref<64x128xf32, #tpu.memory_space<vmem>>, %arg3: memref<256x128xbf16, #tpu.memory_space<vmem>>) attributes {dimension_semantics = [#tpu.dimension_semantics<parallel>], iteration_bounds = array<i64: 1>, scalar_prefetch = 0 : i64, scratch_operands = 0 : i64, tpu.core_type = #tpu.core_type<tc>, window_params = [{transform_indices = @transform_0, window_bounds = array<i64: 256, 64>}, {pipeline_mode = #tpu.pipeline_mode<synchronous>, transform_indices = @transform_1, window_bounds = array<i64: 64, 128>}, {transform_indices = @transform_2, window_bounds = array<i64: 256, 128>}]} {
    %c0 = arith.constant 0 : index
    %c0_0 = arith.constant 0 : index
    %0 = vector.load %arg1[%c0, %c0_0] : memref<256x64xf32, #tpu.memory_space<vmem>>, vector<256x64xf32>
    %c0_1 = arith.constant 0 : index
    %c0_2 = arith.constant 0 : index
    %1 = vector.load %arg2[%c0_1, %c0_2] : memref<64x128xf32, #tpu.memory_space<vmem>>, vector<64x128xf32>
    %cst = arith.constant dense<0.000000e+00> : vector<256x128xf32>
    %2 = tpu.matmul %0, %1, %cst {dimension_numbers = #tpu.dot_dimension_numbers<[1], [0], [0], [1], [0, 0, 1, 1], [], []>} : vector<256x64xf32>, vector<64x128xf32>, vector<256x128xf32> -> vector<256x128xf32>
    %3 = arith.truncf %2 : vector<256x128xf32> to vector<256x128xbf16>
    %c0_3 = arith.constant 0 : index
    %c0_4 = arith.constant 0 : index
    %4 = vector.load %arg3[%c0_3, %c0_4] : memref<256x128xbf16, #tpu.memory_space<vmem>>, vector<256x128xbf16>
    tpu.vector_store %arg3[%c0_3, %c0_4], %3 {strides = array<i32>} : memref<256x128xbf16, #tpu.memory_space<vmem>>, vector<256x128xbf16>,
    return
  }
  func.func @transform_0(%arg0: i32) -> (i32, i32) {
    %c0_i32 = arith.constant 0 : i32
    %c0_i32_0 = arith.constant 0 : i32
    return %arg0, %c0_i32 : i32, i32
  }
  func.func @transform_1(%arg0: i32) -> (i32, i32) {
    %c0_i32 = arith.constant 0 : i32
    %c0_i32_0 = arith.constant 0 : i32
    %c0_i32_1 = arith.constant 0 : i32
    return %c0_i32, %c0_i32_0 : i32, i32
  }
  func.func @transform_2(%arg0: i32) -> (i32, i32) {
    %c0_i32 = arith.constant 0 : i32
    %c0_i32_0 = arith.constant 0 : i32
    return %arg0, %c0_i32 : i32, i32
  }
}

module attributes {stable_mosaic.version = 11 : i64} {
  func.func @_agg_kernel(%arg0: i32, %arg1: i32, %arg2: memref<256x256xbf16, #tpu.memory_space<vmem>>, %arg3: memref<256x128xbf16, #tpu.memory_space<vmem>>, %arg4: memref<1x128xf32, #tpu.memory_space<vmem>>, %arg5: memref<128x128xf32, #tpu.memory_space<vmem>>, %arg6: memref<1x128xf32, #tpu.memory_space<vmem>>, %arg7: memref<256x128xbf16, #tpu.memory_space<vmem>>, %arg8: memref<256x128xf32, #tpu.memory_space<vmem>>) attributes {dimension_semantics = [#tpu.dimension_semantics<parallel>, #tpu.dimension_semantics<arbitrary>], iteration_bounds = array<i64: 1, 1>, scalar_prefetch = 0 : i64, scratch_operands = 1 : i64, tpu.core_type = #tpu.core_type<tc>, window_params = [{transform_indices = @transform_0, window_bounds = array<i64: 256, 256>}, {transform_indices = @transform_1, window_bounds = array<i64: 256, 128>}, {pipeline_mode = #tpu.pipeline_mode<synchronous>, transform_indices = @transform_2, window_bounds = array<i64: 1, 128>}, {pipeline_mode = #tpu.pipeline_mode<synchronous>, transform_indices = @transform_3, window_bounds = array<i64: 128, 128>}, {pipeline_mode = #tpu.pipeline_mode<synchronous>, transform_indices = @transform_4, window_bounds = array<i64: 1, 128>}, {transform_indices = @transform_5, window_bounds = array<i64: 256, 128>}]} {
    %c0_i32 = arith.constant 0 : i32
    %0 = arith.cmpi eq, %arg1, %c0_i32 : i32
    %1 = arith.extui %0 : i1 to i32
    %c0_i32_0 = arith.constant 0 : i32
    %2 = arith.cmpi ne, %1, %c0_i32_0 : i32
    scf.if %2 {
      %cst_10 = arith.constant 0.000000e+00 : f32
      %12 = vector.broadcast %cst_10 : f32 to vector<256x128xf32>
      %c0_11 = arith.constant 0 : index
      %c0_12 = arith.constant 0 : index
      %13 = vector.load %arg8[%c0_11, %c0_12] : memref<256x128xf32, #tpu.memory_space<vmem>>, vector<256x128xf32>
      tpu.vector_store %arg8[%c0_11, %c0_12], %12 {strides = array<i32>} : memref<256x128xf32, #tpu.memory_space<vmem>>, vector<256x128xf32>,
    } else {
    }
    %c0 = arith.constant 0 : index
    %c0_1 = arith.constant 0 : index
    %3 = vector.load %arg8[%c0, %c0_1] : memref<256x128xf32, #tpu.memory_space<vmem>>, vector<256x128xf32>
    %c0_2 = arith.constant 0 : index
    %c0_3 = arith.constant 0 : index
    %4 = vector.load %arg2[%c0_2, %c0_3] : memref<256x256xbf16, #tpu.memory_space<vmem>>, vector<256x256xbf16>
    %c0_4 = arith.constant 0 : index
    %c0_5 = arith.constant 0 : index
    %5 = vector.load %arg3[%c0_4, %c0_5] : memref<256x128xbf16, #tpu.memory_space<vmem>>, vector<256x128xbf16>
    %cst = arith.constant dense<0.000000e+00> : vector<256x128xf32>
    %6 = tpu.matmul %4, %5, %cst {dimension_numbers = #tpu.dot_dimension_numbers<[1], [0], [0], [1], [0, 0, 1, 1], [], []>} : vector<256x256xbf16>, vector<256x128xbf16>, vector<256x128xf32> -> vector<256x128xf32>
    %7 = arith.addf %3, %6 : vector<256x128xf32>
    %c0_6 = arith.constant 0 : index
    %c0_7 = arith.constant 0 : index
    %8 = vector.load %arg8[%c0_6, %c0_7] : memref<256x128xf32, #tpu.memory_space<vmem>>, vector<256x128xf32>
    tpu.vector_store %arg8[%c0_6, %c0_7], %7 {strides = array<i32>} : memref<256x128xf32, #tpu.memory_space<vmem>>, vector<256x128xf32>,
    %c0_i32_8 = arith.constant 0 : i32
    %9 = arith.cmpi eq, %arg1, %c0_i32_8 : i32
    %10 = arith.extui %9 : i1 to i32
    %c0_i32_9 = arith.constant 0 : i32
    %11 = arith.cmpi ne, %10, %c0_i32_9 : i32
    scf.if %11 {
      %c0_10 = arith.constant 0 : index
      %c0_11 = arith.constant 0 : index
      %12 = vector.load %arg8[%c0_10, %c0_11] : memref<256x128xf32, #tpu.memory_space<vmem>>, vector<256x128xf32>
      %c0_12 = arith.constant 0 : index
      %c0_13 = arith.constant 0 : index
      %13 = vector.load %arg4[%c0_12, %c0_13] : memref<1x128xf32, #tpu.memory_space<vmem>>, vector<1x128xf32>
      %14 = vector.broadcast %13 : vector<1x128xf32> to vector<256x128xf32>
      %15 = arith.addf %12, %14 : vector<256x128xf32>
      %cst_14 = arith.constant 0.000000e+00 : f32
      %16 = vector.broadcast %cst_14 : f32 to vector<256x128xf32>
      %17 = arith.maximumf %15, %16 : vector<256x128xf32>
      %c0_15 = arith.constant 0 : index
      %c0_16 = arith.constant 0 : index
      %18 = vector.load %arg5[%c0_15, %c0_16] : memref<128x128xf32, #tpu.memory_space<vmem>>, vector<128x128xf32>
      %cst_17 = arith.constant dense<0.000000e+00> : vector<256x128xf32>
      %19 = tpu.matmul %17, %18, %cst_17 {dimension_numbers = #tpu.dot_dimension_numbers<[1], [0], [0], [1], [0, 0, 1, 1], [], []>} : vector<256x128xf32>, vector<128x128xf32>, vector<256x128xf32> -> vector<256x128xf32>
      %c0_18 = arith.constant 0 : index
      %c0_19 = arith.constant 0 : index
      %20 = vector.load %arg6[%c0_18, %c0_19] : memref<1x128xf32, #tpu.memory_space<vmem>>, vector<1x128xf32>
      %21 = vector.broadcast %20 : vector<1x128xf32> to vector<256x128xf32>
      %22 = arith.addf %19, %21 : vector<256x128xf32>
      %23 = arith.truncf %22 : vector<256x128xf32> to vector<256x128xbf16>
      %c0_20 = arith.constant 0 : index
      %c0_21 = arith.constant 0 : index
      %24 = vector.load %arg7[%c0_20, %c0_21] : memref<256x128xbf16, #tpu.memory_space<vmem>>, vector<256x128xbf16>
      tpu.vector_store %arg7[%c0_20, %c0_21], %23 {strides = array<i32>} : memref<256x128xbf16, #tpu.memory_space<vmem>>, vector<256x128xbf16>,
    } else {
    }
    return
  }
  func.func @transform_0(%arg0: i32, %arg1: i32) -> (i32, i32) {
    %c0_i32 = arith.constant 0 : i32
    return %arg0, %arg1 : i32, i32
  }
  func.func @transform_1(%arg0: i32, %arg1: i32) -> (i32, i32) {
    %c0_i32 = arith.constant 0 : i32
    %c0_i32_0 = arith.constant 0 : i32
    return %arg1, %c0_i32 : i32, i32
  }
  func.func @transform_2(%arg0: i32, %arg1: i32) -> (i32, i32) {
    %c0_i32 = arith.constant 0 : i32
    %c0_i32_0 = arith.constant 0 : i32
    %c0_i32_1 = arith.constant 0 : i32
    return %c0_i32, %c0_i32_0 : i32, i32
  }
  func.func @transform_3(%arg0: i32, %arg1: i32) -> (i32, i32) {
    %c0_i32 = arith.constant 0 : i32
    %c0_i32_0 = arith.constant 0 : i32
    %c0_i32_1 = arith.constant 0 : i32
    return %c0_i32, %c0_i32_0 : i32, i32
  }
  func.func @transform_4(%arg0: i32, %arg1: i32) -> (i32, i32) {
    %c0_i32 = arith.constant 0 : i32
    %c0_i32_0 = arith.constant 0 : i32
    %c0_i32_1 = arith.constant 0 : i32
    return %c0_i32, %c0_i32_0 : i32, i32
  }
  func.func @transform_5(%arg0: i32, %arg1: i32) -> (i32, i32) {
    %c0_i32 = arith.constant 0 : i32
    %c0_i32_0 = arith.constant 0 : i32
    return %arg0, %c0_i32 : i32, i32
  }
}

module attributes {stable_mosaic.version = 11 : i64} {
  func.func @_agg_kernel(%arg0: i32, %arg1: i32, %arg2: memref<256x256xbf16, #tpu.memory_space<vmem>>, %arg3: memref<256x128xbf16, #tpu.memory_space<vmem>>, %arg4: memref<1x128xf32, #tpu.memory_space<vmem>>, %arg5: memref<128x128xf32, #tpu.memory_space<vmem>>, %arg6: memref<1x128xf32, #tpu.memory_space<vmem>>, %arg7: memref<256x128xf32, #tpu.memory_space<vmem>>, %arg8: memref<256x128xf32, #tpu.memory_space<vmem>>) attributes {dimension_semantics = [#tpu.dimension_semantics<parallel>, #tpu.dimension_semantics<arbitrary>], iteration_bounds = array<i64: 1, 1>, scalar_prefetch = 0 : i64, scratch_operands = 1 : i64, tpu.core_type = #tpu.core_type<tc>, window_params = [{transform_indices = @transform_0, window_bounds = array<i64: 256, 256>}, {transform_indices = @transform_1, window_bounds = array<i64: 256, 128>}, {pipeline_mode = #tpu.pipeline_mode<synchronous>, transform_indices = @transform_2, window_bounds = array<i64: 1, 128>}, {pipeline_mode = #tpu.pipeline_mode<synchronous>, transform_indices = @transform_3, window_bounds = array<i64: 128, 128>}, {pipeline_mode = #tpu.pipeline_mode<synchronous>, transform_indices = @transform_4, window_bounds = array<i64: 1, 128>}, {transform_indices = @transform_5, window_bounds = array<i64: 256, 128>}]} {
    %c0_i32 = arith.constant 0 : i32
    %0 = arith.cmpi eq, %arg1, %c0_i32 : i32
    %1 = arith.extui %0 : i1 to i32
    %c0_i32_0 = arith.constant 0 : i32
    %2 = arith.cmpi ne, %1, %c0_i32_0 : i32
    scf.if %2 {
      %cst_10 = arith.constant 0.000000e+00 : f32
      %12 = vector.broadcast %cst_10 : f32 to vector<256x128xf32>
      %c0_11 = arith.constant 0 : index
      %c0_12 = arith.constant 0 : index
      %13 = vector.load %arg8[%c0_11, %c0_12] : memref<256x128xf32, #tpu.memory_space<vmem>>, vector<256x128xf32>
      tpu.vector_store %arg8[%c0_11, %c0_12], %12 {strides = array<i32>} : memref<256x128xf32, #tpu.memory_space<vmem>>, vector<256x128xf32>,
    } else {
    }
    %c0 = arith.constant 0 : index
    %c0_1 = arith.constant 0 : index
    %3 = vector.load %arg8[%c0, %c0_1] : memref<256x128xf32, #tpu.memory_space<vmem>>, vector<256x128xf32>
    %c0_2 = arith.constant 0 : index
    %c0_3 = arith.constant 0 : index
    %4 = vector.load %arg2[%c0_2, %c0_3] : memref<256x256xbf16, #tpu.memory_space<vmem>>, vector<256x256xbf16>
    %c0_4 = arith.constant 0 : index
    %c0_5 = arith.constant 0 : index
    %5 = vector.load %arg3[%c0_4, %c0_5] : memref<256x128xbf16, #tpu.memory_space<vmem>>, vector<256x128xbf16>
    %cst = arith.constant dense<0.000000e+00> : vector<256x128xf32>
    %6 = tpu.matmul %4, %5, %cst {dimension_numbers = #tpu.dot_dimension_numbers<[1], [0], [0], [1], [0, 0, 1, 1], [], []>} : vector<256x256xbf16>, vector<256x128xbf16>, vector<256x128xf32> -> vector<256x128xf32>
    %7 = arith.addf %3, %6 : vector<256x128xf32>
    %c0_6 = arith.constant 0 : index
    %c0_7 = arith.constant 0 : index
    %8 = vector.load %arg8[%c0_6, %c0_7] : memref<256x128xf32, #tpu.memory_space<vmem>>, vector<256x128xf32>
    tpu.vector_store %arg8[%c0_6, %c0_7], %7 {strides = array<i32>} : memref<256x128xf32, #tpu.memory_space<vmem>>, vector<256x128xf32>,
    %c0_i32_8 = arith.constant 0 : i32
    %9 = arith.cmpi eq, %arg1, %c0_i32_8 : i32
    %10 = arith.extui %9 : i1 to i32
    %c0_i32_9 = arith.constant 0 : i32
    %11 = arith.cmpi ne, %10, %c0_i32_9 : i32
    scf.if %11 {
      %c0_10 = arith.constant 0 : index
      %c0_11 = arith.constant 0 : index
      %12 = vector.load %arg8[%c0_10, %c0_11] : memref<256x128xf32, #tpu.memory_space<vmem>>, vector<256x128xf32>
      %c0_12 = arith.constant 0 : index
      %c0_13 = arith.constant 0 : index
      %13 = vector.load %arg4[%c0_12, %c0_13] : memref<1x128xf32, #tpu.memory_space<vmem>>, vector<1x128xf32>
      %14 = vector.broadcast %13 : vector<1x128xf32> to vector<256x128xf32>
      %15 = arith.addf %12, %14 : vector<256x128xf32>
      %cst_14 = arith.constant 0.000000e+00 : f32
      %16 = vector.broadcast %cst_14 : f32 to vector<256x128xf32>
      %17 = arith.maximumf %15, %16 : vector<256x128xf32>
      %c0_15 = arith.constant 0 : index
      %c0_16 = arith.constant 0 : index
      %18 = vector.load %arg5[%c0_15, %c0_16] : memref<128x128xf32, #tpu.memory_space<vmem>>, vector<128x128xf32>
      %cst_17 = arith.constant dense<0.000000e+00> : vector<256x128xf32>
      %19 = tpu.matmul %17, %18, %cst_17 {dimension_numbers = #tpu.dot_dimension_numbers<[1], [0], [0], [1], [0, 0, 1, 1], [], []>} : vector<256x128xf32>, vector<128x128xf32>, vector<256x128xf32> -> vector<256x128xf32>
      %c0_18 = arith.constant 0 : index
      %c0_19 = arith.constant 0 : index
      %20 = vector.load %arg6[%c0_18, %c0_19] : memref<1x128xf32, #tpu.memory_space<vmem>>, vector<1x128xf32>
      %21 = vector.broadcast %20 : vector<1x128xf32> to vector<256x128xf32>
      %22 = arith.addf %19, %21 : vector<256x128xf32>
      %23 = tpu.iota {dimensions = array<i32: 1>} : vector<256x128xi32>
      %c8_i32 = arith.constant 8 : i32
      %24 = vector.broadcast %c8_i32 : i32 to vector<256x128xi32>
      %25 = arith.cmpi slt, %23, %24 : vector<256x128xi32>
      %cst_20 = arith.constant -1.000000e+30 : f32
      %26 = vector.broadcast %cst_20 : f32 to vector<256x128xf32>
      %27 = arith.select %25, %22, %26 : vector<256x128xi1>, vector<256x128xf32>
      %cst_21 = arith.constant dense<0xFF800000> : vector<256xf32>
      %28 = vector.multi_reduction <maximumf>, %27, %cst_21 [1] : vector<256x128xf32> to vector<256xf32>
      %29 = vector.shape_cast %28 : vector<256xf32> to vector<256x1xf32>
      %30 = vector.broadcast %29 : vector<256x1xf32> to vector<256x128xf32>
      %31 = arith.subf %27, %30 : vector<256x128xf32>
      %32 = math.exp %31 : vector<256x128xf32>
      %cst_22 = arith.constant dense<0.000000e+00> : vector<256xf32>
      %33 = vector.multi_reduction <add>, %32, %cst_22 [1] : vector<256x128xf32> to vector<256xf32>
      %34 = vector.shape_cast %33 : vector<256xf32> to vector<256x1xf32>
      %35 = math.log %34 : vector<256x1xf32>
      %36 = vector.broadcast %35 : vector<256x1xf32> to vector<256x128xf32>
      %37 = arith.subf %31, %36 : vector<256x128xf32>
      %c0_23 = arith.constant 0 : index
      %c0_24 = arith.constant 0 : index
      %38 = vector.load %arg7[%c0_23, %c0_24] : memref<256x128xf32, #tpu.memory_space<vmem>>, vector<256x128xf32>
      tpu.vector_store %arg7[%c0_23, %c0_24], %37 {strides = array<i32>} : memref<256x128xf32, #tpu.memory_space<vmem>>, vector<256x128xf32>,
    } else {
    }
    return
  }
  func.func @transform_0(%arg0: i32, %arg1: i32) -> (i32, i32) {
    %c0_i32 = arith.constant 0 : i32
    return %arg0, %arg1 : i32, i32
  }
  func.func @transform_1(%arg0: i32, %arg1: i32) -> (i32, i32) {
    %c0_i32 = arith.constant 0 : i32
    %c0_i32_0 = arith.constant 0 : i32
    return %arg1, %c0_i32 : i32, i32
  }
  func.func @transform_2(%arg0: i32, %arg1: i32) -> (i32, i32) {
    %c0_i32 = arith.constant 0 : i32
    %c0_i32_0 = arith.constant 0 : i32
    %c0_i32_1 = arith.constant 0 : i32
    return %c0_i32, %c0_i32_0 : i32, i32
  }
  func.func @transform_3(%arg0: i32, %arg1: i32) -> (i32, i32) {
    %c0_i32 = arith.constant 0 : i32
    %c0_i32_0 = arith.constant 0 : i32
    %c0_i32_1 = arith.constant 0 : i32
    return %c0_i32, %c0_i32_0 : i32, i32
  }
  func.func @transform_4(%arg0: i32, %arg1: i32) -> (i32, i32) {
    %c0_i32 = arith.constant 0 : i32
    %c0_i32_0 = arith.constant 0 : i32
    %c0_i32_1 = arith.constant 0 : i32
    return %c0_i32, %c0_i32_0 : i32, i32
  }
  func.func @transform_5(%arg0: i32, %arg1: i32) -> (i32, i32) {
    %c0_i32 = arith.constant 0 : i32
    %c0_i32_0 = arith.constant 0 : i32
    return %arg0, %c0_i32 : i32, i32
  }
}

</mosaic_0001>

<bundles_post_ra>
// kernel: gcn2layer_forward.3
= control target key start
LH: loop header
LB: loop body
LE: loop exit
PB: predicated region body
PF: predicated region fallthrough
CT: control target
= control target key end

     0   :  { %vm51_vm0 = vcmask 523264   ;;  %s1071_s1 = inlined_call_operand.vmem [shape: f32[64,128], index: 1, kind: input, shape index: {}]   ;;  %s1072_s0 = inlined_call_operand.vmem [shape: f32[256,64], index: 0, kind: input, shape index: {}]   ;;  %s1073_s2 = inlined_call_operand.vmem [shape: bf16[256,128], index: 2, kind: output, shape index: {}]  }
   0x1   :  { %v43_v0 = vld [vmem:[%s1071_s1] sm:$0xff]  ;;  %v44_v1 = vld [vmem:[%s1071_s1 + $0x8] sm:$0xff]  ;;  %v45_v2 = vld [vmem:[%s1071_s1 + $0x10] sm:$0xff] }
   0x2   :  { %v832_v3 = vpack.c.bf16 %v44_v1, %v43_v0  ;;  %v46_v4 = vld [vmem:[%s1071_s1 + $0x18] sm:$0xff]  ;;  %v47_v6 = vld [vmem:[%s1071_s1 + $0x20] sm:$0xff]  ;;  %v48_v7 = vld [vmem:[%s1071_s1 + $0x28] sm:$0xff] }
   0x3   :  { %v836_v5 = vpack.c.bf16 %v46_v4, %v45_v2  ;;  %v11_v8 = vld [vmem:[%s1072_s0] sm:$0xff]  ;;  %v840_v10 = vpack.c.bf16 %v48_v7, %v47_v6  ;;  %v49_v11 = vld [vmem:[%s1071_s1 + $0x30] sm:$0xff]  ;;  %v50_v12 = vld [vmem:[%s1071_s1 + $0x38] sm:$0xff] }
   0x4   :  { %833 = vmatprep.subr.bf16.mxu0 %v832_v3  ;;  %848 = vmatprep.subr.bf16.mxu1 %v832_v3  ;;  %v27_v9 = vld [vmem:[%s1072_s0 + $0x80] sm:$0xff]  ;;  %v844_v13 = vpack.c.bf16 %v50_v12, %v49_v11  ;;  %v12_v14 = vld [vmem:[%s1072_s0 + $0x8] sm:$0xff]  ;;  %v13_v16 = vld [vmem:[%s1072_s0 + $0x10] sm:$0xff] }
   0x5   :  { %835 = vmatpush3.bf16.msra.mxu0 %v832_v3  ;;  %852 = vmatpush3.bf16.msra.mxu1 %v832_v3  ;;  %v28_v15 = vld [vmem:[%s1072_s0 + $0x88] sm:$0xff]  ;;  %v29_v17 = vld [vmem:[%s1072_s0 + $0x90] sm:$0xff]  ;;  %v14_v18 = vld [vmem:[%s1072_s0 + $0x18] sm:$0xff] }
   0x6   :  { %837 = vmatprep.subr.bf16.mxu0 %v836_v5  ;;  %849 = vmatprep.subr.bf16.mxu1 %v836_v5  ;;  %v30_v19 = vld [vmem:[%s1072_s0 + $0x98] sm:$0xff]  ;;  %v15_v20 = vld [vmem:[%s1072_s0 + $0x20] sm:$0xff]  ;;  %v16_v22 = vld [vmem:[%s1072_s0 + $0x28] sm:$0xff] }
   0x7   :  { %784 = vmatprep.mubr.msk.f32.mxu0 %vm51_vm0, %v11_v8  ;;  %808 = vmatprep.mubr.msk.f32.mxu1 %vm51_vm0, %v27_v9  ;;  %v31_v21 = vld [vmem:[%s1072_s0 + $0xa0] sm:$0xff]  ;;  %v32_v23 = vld [vmem:[%s1072_s0 + $0xa8] sm:$0xff]  ;;  %v17_v24 = vld [vmem:[%s1072_s0 + $0x30] sm:$0xff] }
   0x8   :  { %v33_v25 = vld [vmem:[%s1072_s0 + $0xb0] sm:$0xff]  ;;  %v18_v26 = vld [vmem:[%s1072_s0 + $0x38] sm:$0xff]  ;;  %v19_v28 = vld [vmem:[%s1072_s0 + $0x40] sm:$0xff] }
   0x9   :  { %839 = vmatpush3.bf16.msra.mxu0 %v836_v5  ;;  %853 = vmatpush3.bf16.msra.mxu1 %v836_v5  ;;  %v34_v27 = vld [vmem:[%s1072_s0 + $0xb8] sm:$0xff]  ;;  %v35_v29 = vld [vmem:[%s1072_s0 + $0xc0] sm:$0xff]  ;;  %v20_v30 = vld [vmem:[%s1072_s0 + $0x48] sm:$0xff] }
   0xa   :  { %841 = vmatprep.subr.bf16.mxu0 %v840_v10  ;;  %850 = vmatprep.subr.bf16.mxu1 %v840_v10  ;;  %v36_v31 = vld [vmem:[%s1072_s0 + $0xc8] sm:$0xff]  ;;  %v21_v32 = vld [vmem:[%s1072_s0 + $0x50] sm:$0xff]  ;;  %v22_v34 = vld [vmem:[%s1072_s0 + $0x58] sm:$0xff] }
   0xb   :  { %v37_v33 = vld [vmem:[%s1072_s0 + $0xd0] sm:$0xff]  ;;  %v38_v35 = vld [vmem:[%s1072_s0 + $0xd8] sm:$0xff]  ;;  %v23_v36 = vld [vmem:[%s1072_s0 + $0x60] sm:$0xff] }
   0xc   :  { %v39_v37 = vld [vmem:[%s1072_s0 + $0xe0] sm:$0xff]  ;;  %v24_v38 = vld [vmem:[%s1072_s0 + $0x68] sm:$0xff]  ;;  %v25_v40 = vld [vmem:[%s1072_s0 + $0x70] sm:$0xff] }
   0xd   :  { %843 = vmatpush3.bf16.msra.mxu0 %v840_v10  ;;  %854 = vmatpush3.bf16.msra.mxu1 %v840_v10  ;;  %v40_v39 = vld [vmem:[%s1072_s0 + $0xe8] sm:$0xff]  ;;  %v41_v41 = vld [vmem:[%s1072_s0 + $0xf0] sm:$0xff]  ;;  %v26_v42 = vld [vmem:[%s1072_s0 + $0x78] sm:$0xff] }
   0xe   :  { %845 = vmatprep.subr.bf16.mxu0 %v844_v13  ;;  %851 = vmatprep.subr.bf16.mxu1 %v844_v13  ;;  %v42_v43 = vld [vmem:[%s1072_s0 + $0xf8] sm:$0xff] }
  0x11   :  { %847 = vmatpush3.bf16.msra.mxu0 %v844_v13  ;;  %855 = vmatpush3.bf16.msra.mxu1 %v844_v13 }
  0x14   :  { %785 = vmatmul.mubr.msk.f32.vlgmr.msra.gmra.mrb[0].mxu0 %vm51_vm0, %v12_v14  ;;  %809 = vmatmul.mubr.msk.f32.vlgmr.msra.gmra.mrb[0].mxu1 %vm51_vm0, %v28_v15 }
  0x15   :  { %787 = vmatprep.mubr.msk.f32.mxu0 %vm51_vm0, %v13_v16  ;;  %811 = vmatprep.mubr.msk.f32.mxu1 %vm51_vm0, %v29_v17 }
  0x18   :  { %788 = vmatmul.mubr.msk.f32.gmra.mrb[2].mxu0 %vm51_vm0, %v14_v18  ;;  %812 = vmatmul.mubr.msk.f32.gmra.mrb[2].mxu1 %vm51_vm0, %v30_v19 }
  0x19   :  { %790 = vmatprep.mubr.msk.f32.mxu0 %vm51_vm0, %v15_v20  ;;  %814 = vmatprep.mubr.msk.f32.mxu1 %vm51_vm0, %v31_v21 }
  0x1c   :  { %791 = vmatmul.mubr.msk.f32.gmra.mrb[4].mxu0 %vm51_vm0, %v16_v22  ;;  %815 = vmatmul.mubr.msk.f32.gmra.mrb[4].mxu1 %vm51_vm0, %v32_v23 }
  0x1d   :  { %793 = vmatprep.mubr.msk.f32.mxu0 %vm51_vm0, %v17_v24  ;;  %817 = vmatprep.mubr.msk.f32.mxu1 %vm51_vm0, %v33_v25 }
  0x20   :  { %794 = vmatmul.mubr.msk.f32.gmra.mrb[6].mxu0 %vm51_vm0, %v18_v26  ;;  %818 = vmatmul.mubr.msk.f32.gmra.mrb[6].mxu1 %vm51_vm0, %v34_v27 }
  0x21   :  { %796 = vmatprep.mubr.msk.f32.mxu0 %vm51_vm0, %v19_v28  ;;  %820 = vmatprep.mubr.msk.f32.mxu1 %vm51_vm0, %v35_v29 }
  0x24   :  { %797 = vmatmul.mubr.msk.f32.gmra.mrb[8].mxu0 %vm51_vm0, %v20_v30  ;;  %821 = vmatmul.mubr.msk.f32.gmra.mrb[8].mxu1 %vm51_vm0, %v36_v31 }
  0x25   :  { %799 = vmatprep.mubr.msk.f32.mxu0 %vm51_vm0, %v21_v32  ;;  %823 = vmatprep.mubr.msk.f32.mxu1 %vm51_vm0, %v37_v33 }
  0x28   :  { %800 = vmatmul.mubr.msk.f32.gmra.mrb[10].mxu0 %vm51_vm0, %v22_v34  ;;  %824 = vmatmul.mubr.msk.f32.gmra.mrb[10].mxu1 %vm51_vm0, %v38_v35 }
  0x29   :  { %802 = vmatprep.mubr.msk.f32.mxu0 %vm51_vm0, %v23_v36  ;;  %826 = vmatprep.mubr.msk.f32.mxu1 %vm51_vm0, %v39_v37 }
  0x2c   :  { %803 = vmatmul.mubr.msk.f32.gmra.mrb[12].mxu0 %vm51_vm0, %v24_v38  ;;  %827 = vmatmul.mubr.msk.f32.gmra.mrb[12].mxu1 %vm51_vm0, %v40_v39 }
  0x2d   :  { %805 = vmatprep.mubr.msk.f32.mxu0 %vm51_vm0, %v25_v40  ;;  %829 = vmatprep.mubr.msk.f32.mxu1 %vm51_vm0, %v41_v41 }
  0x30   :  { %806 = vmatmul.mubr.msk.f32.gmra.mrb[14].mxu0 %vm51_vm0, %v26_v42  ;;  %830 = vmatmul.mubr.msk.f32.gmra.mrb[14].mxu1 %vm51_vm0, %v42_v43 }
  0xe7   :  { %v786_v44 = vpop.f32.mrb[0].mxu0  ;;  %v810_v45 = vpop.f32.mrb[0].mxu1 }
  0xe8   :  { %v214_v46 = vpop.f32.mrb[1].mxu0  ;;  %v294_v47 = vpop.f32.mrb[1].mxu1 }
  0xe9   :  { %v636_v48 = vpack.c.bf16 %v786_v44, %v214_v46  ;;  %v676_v49 = vpack.c.bf16 %v810_v45, %v294_v47 }
  0xeb   :  { %637 = vst [vmem:[%s1073_s2] sm:$0xff] %v636_v48   ;;  %720 = vst [vmem:[%s1073_s2 + $0x40] sm:$0xff] %v676_v49   ;;  %v789_v50 = vpop.f32.mrb[2].mxu0  ;;  %v813_v51 = vpop.f32.mrb[2].mxu1 }
  0xec   :  { %v224_v52 = vpop.f32.mrb[3].mxu0  ;;  %v304_v53 = vpop.f32.mrb[3].mxu1 }
  0xed   :  { %v641_v54 = vpack.c.bf16 %v789_v50, %v224_v52  ;;  %v681_v55 = vpack.c.bf16 %v813_v51, %v304_v53 }
  0xef   :  { %713 = vst [vmem:[%s1073_s2 + $0x8] sm:$0xff] %v641_v54   ;;  %721 = vst [vmem:[%s1073_s2 + $0x48] sm:$0xff] %v681_v55   ;;  %v792_v56 = vpop.f32.mrb[4].mxu0  ;;  %v816_v57 = vpop.f32.mrb[4].mxu1 }
  0xf0   :  { %v234_v58 = vpop.f32.mrb[5].mxu0  ;;  %v314_v59 = vpop.f32.mrb[5].mxu1 }
  0xf1   :  { %v646_v60 = vpack.c.bf16 %v792_v56, %v234_v58  ;;  %v686_v61 = vpack.c.bf16 %v816_v57, %v314_v59 }
  0xf3   :  { %714 = vst [vmem:[%s1073_s2 + $0x10] sm:$0xff] %v646_v60   ;;  %722 = vst [vmem:[%s1073_s2 + $0x50] sm:$0xff] %v686_v61   ;;  %v795_v62 = vpop.f32.mrb[6].mxu0  ;;  %v819_v63 = vpop.f32.mrb[6].mxu1 }
  0xf4   :  { %v244_v0 = vpop.f32.mrb[7].mxu0  ;;  %v324_v1 = vpop.f32.mrb[7].mxu1 }
  0xf5   :  { %v651_v2 = vpack.c.bf16 %v795_v62, %v244_v0  ;;  %v691_v3 = vpack.c.bf16 %v819_v63, %v324_v1 }
  0xf7   :  { %715 = vst [vmem:[%s1073_s2 + $0x18] sm:$0xff] %v651_v2   ;;  %723 = vst [vmem:[%s1073_s2 + $0x58] sm:$0xff] %v691_v3   ;;  %v798_v4 = vpop.f32.mrb[8].mxu0  ;;  %v822_v5 = vpop.f32.mrb[8].mxu1 }
  0xf8   :  { %v254_v6 = vpop.f32.mrb[9].mxu0  ;;  %v334_v7 = vpop.f32.mrb[9].mxu1 }
  0xf9   :  { %v656_v8 = vpack.c.bf16 %v798_v4, %v254_v6  ;;  %v696_v9 = vpack.c.bf16 %v822_v5, %v334_v7 }
  0xfb   :  { %716 = vst [vmem:[%s1073_s2 + $0x20] sm:$0xff] %v656_v8   ;;  %724 = vst [vmem:[%s1073_s2 + $0x60] sm:$0xff] %v696_v9   ;;  %v801_v10 = vpop.f32.mrb[10].mxu0  ;;  %v825_v11 = vpop.f32.mrb[10].mxu1 }
  0xfc   :  { %v264_v12 = vpop.f32.mrb[11].mxu0  ;;  %v344_v13 = vpop.f32.mrb[11].mxu1 }
  0xfd   :  { %v661_v14 = vpack.c.bf16 %v801_v10, %v264_v12  ;;  %v701_v15 = vpack.c.bf16 %v825_v11, %v344_v13 }
  0xff   :  { %717 = vst [vmem:[%s1073_s2 + $0x28] sm:$0xff] %v661_v14   ;;  %725 = vst [vmem:[%s1073_s2 + $0x68] sm:$0xff] %v701_v15   ;;  %v804_v16 = vpop.f32.mrb[12].mxu0  ;;  %v828_v17 = vpop.f32.mrb[12].mxu1 }
 0x100   :  { %v274_v18 = vpop.f32.mrb[13].mxu0  ;;  %v354_v19 = vpop.f32.mrb[13].mxu1 }
 0x101   :  { %v666_v20 = vpack.c.bf16 %v804_v16, %v274_v18  ;;  %v706_v21 = vpack.c.bf16 %v828_v17, %v354_v19 }
 0x103   :  { %718 = vst [vmem:[%s1073_s2 + $0x30] sm:$0xff] %v666_v20   ;;  %726 = vst [vmem:[%s1073_s2 + $0x70] sm:$0xff] %v706_v21   ;;  %v807_v22 = vpop.f32.mrb[14].mxu0  ;;  %v831_v23 = vpop.f32.mrb[14].mxu1 }
 0x104   :  { %v284_v24 = vpop.f32.mrb[15].mxu0  ;;  %v364_v25 = vpop.f32.mrb[15].mxu1 }
 0x105   :  { %v671_v26 = vpack.c.bf16 %v807_v22, %v284_v24  ;;  %v711_v27 = vpack.c.bf16 %v831_v23, %v364_v25 }
 0x107   :  { %719 = vst [vmem:[%s1073_s2 + $0x38] sm:$0xff] %v671_v26   ;;  %727 = vst [vmem:[%s1073_s2 + $0x78] sm:$0xff] %v711_v27  }

// kernel: gcn2layer_forward.4
= control target key start
LH: loop header
LB: loop body
LE: loop exit
PB: predicated region body
PF: predicated region fallthrough
CT: control target
= control target key end

     0   :  { %s2081_s1 = inlined_call_operand.vmem [shape: bf16[256,128], index: 1, kind: input, shape index: {}]   ;;  %s2082_s0 = inlined_call_operand.vmem [shape: bf16[256,256], index: 0, kind: input, shape index: {}]   ;;  %s2083_s3 = inlined_call_operand.vmem [shape: f32[128,128], index: 3, kind: input, shape index: {}]   ;;  %s2084_s2 = inlined_call_operand.vmem [shape: f32[1,128], index: 2, kind: input, shape index: {}]   ;;  %s2085_s4 = inlined_call_operand.vmem [shape: f32[1,128], index: 4, kind: input, shape index: {}]   ;;  %s2086_s5 = inlined_call_operand.vmem [shape: bf16[256,128], index: 5, kind: output, shape index: {}]  }
   0x1   :  { %v1649_v0 = vld [vmem:[%s2081_s1 + $0x40] sm:$0xff]   ;;  %v1651_v2 = vld [vmem:[%s2081_s1 + $0x48] sm:$0xff]   ;;  %v1653_v4 = vld [vmem:[%s2081_s1 + $0x50] sm:$0xff]  }
   0x2   :  { %v1650_v1 = vld [vmem:[%s2081_s1] sm:$0xff]   ;;  %1361 = vmatprep.subr.bf16.mxu0 %v1649_v0  ;;  %1633 = vmatprep.subr.bf16.mxu1 %v1649_v0  ;;  %v1652_v3 = vld [vmem:[%s2081_s1 + $0x8] sm:$0xff]   ;;  %v1654_v5 = vld [vmem:[%s2081_s1 + $0x10] sm:$0xff]  }
   0x3   :  { %1362 = vmatpush3.bf16.msra.mxu0 %v1650_v1  ;;  %1641 = vmatpush3.bf16.msra.mxu1 %v1650_v1  ;;  %v1655_v6 = vld [vmem:[%s2081_s1 + $0x58] sm:$0xff]   ;;  %v1657_v8 = vld [vmem:[%s2081_s1 + $0x60] sm:$0xff]   ;;  %v1659_v10 = vld [vmem:[%s2081_s1 + $0x68] sm:$0xff]  }
   0x4   :  { %1363 = vmatprep.subr.bf16.mxu0 %v1651_v2  ;;  %1634 = vmatprep.subr.bf16.mxu1 %v1651_v2  ;;  %v1656_v7 = vld [vmem:[%s2081_s1 + $0x18] sm:$0xff]   ;;  %v1658_v9 = vld [vmem:[%s2081_s1 + $0x20] sm:$0xff]   ;;  %v1660_v12 = vld [vmem:[%s2081_s1 + $0x28] sm:$0xff]  }
   0x5   :  { %v1667_v11 = vld [vmem:[%s2082_s0 + $0x4] ss:$8 sps:$4 sm:$0xff]   ;;  %v1661_v13 = vld [vmem:[%s2081_s1 + $0x70] sm:$0xff]   ;;  %v1663_v15 = vld [vmem:[%s2081_s1 + $0x78] sm:$0xff]  }
   0x6   :  { %441 = vmatprep.mubr.bf16.mxu0 %v1667_v11  ;;  %v1662_v14 = vld [vmem:[%s2081_s1 + $0x30] sm:$0xff]   ;;  %v1664_v16 = vld [vmem:[%s2081_s1 + $0x38] sm:$0xff]   ;;  %v1665_v17 = vld [vmem:[%s2082_s0] ss:$8 sps:$4 sm:$0xff]  }
   0x7   :  { %1364 = vmatpush3.bf16.msra.mxu0 %v1652_v3  ;;  %1642 = vmatpush3.bf16.msra.mxu1 %v1652_v3  ;;  %v1697_v18 = vld [vmem:[%s2082_s0 + $0xc4] ss:$8 sps:$4 sm:$0xff]   ;;  %v1668_v19 = vld [vmem:[%s2082_s0 + $0x14] ss:$8 sps:$4 sm:$0xff]   ;;  %v1695_v20 = vld [vmem:[%s2082_s0 + $0xc0] ss:$8 sps:$4 sm:$0xff]  }
   0x8   :  { %1365 = vmatprep.subr.bf16.mxu0 %v1653_v4  ;;  %1635 = vmatprep.subr.bf16.mxu1 %v1653_v4  ;;  %v1701_v21 = vld [vmem:[%s2082_s0 + $0xd4] ss:$8 sps:$4 sm:$0xff]   ;;  %v1670_v22 = vld [vmem:[%s2082_s0 + $0x10] ss:$8 sps:$4 sm:$0xff]   ;;  %v740_v23 = vld [vmem:[%s2083_s3] sm:$0xff] }
   0x9   :  { %537 = vmatprep.mubr.bf16.mxu1 %v1697_v18  ;;  %v741_v24 = vld [vmem:[%s2083_s3 + $0x8] sm:$0xff]  ;;  %v742_v27 = vld [vmem:[%s2083_s3 + $0x10] sm:$0xff]  ;;  %v743_v28 = vld [vmem:[%s2083_s3 + $0x18] sm:$0xff] }
   0xa   :  { %v1671_v25 = vld [vmem:[%s2082_s0 + $0x24] ss:$8 sps:$4 sm:$0xff]   ;;  %v1601_v26 = vpack.c.bf16 %v741_v24, %v740_v23  ;;  %v1703_v29 = vld [vmem:[%s2082_s0 + $0xd0] ss:$8 sps:$4 sm:$0xff]   ;;  %v1605_v30 = vpack.c.bf16 %v743_v28, %v742_v27  ;;  %v1673_v37 = vld [vmem:[%s2082_s0 + $0x20] ss:$8 sps:$4 sm:$0xff]  }
   0xb   :  { %1366 = vmatpush3.bf16.msra.mxu0 %v1654_v5  ;;  %1643 = vmatpush3.bf16.msra.mxu1 %v1654_v5  ;;  %v744_v31 = vld [vmem:[%s2083_s3 + $0x20] sm:$0xff]  ;;  %v745_v32 = vld [vmem:[%s2083_s3 + $0x28] sm:$0xff]  ;;  %v746_v35 = vld [vmem:[%s2083_s3 + $0x30] sm:$0xff] }
   0xc   :  { %1367 = vmatprep.subr.bf16.mxu0 %v1655_v6  ;;  %1636 = vmatprep.subr.bf16.mxu1 %v1655_v6  ;;  %v1707_v33 = vld [vmem:[%s2082_s0 + $0xe4] ss:$8 sps:$4 sm:$0xff]   ;;  %v1609_v34 = vpack.c.bf16 %v745_v32, %v744_v31  ;;  %v747_v36 = vld [vmem:[%s2083_s3 + $0x38] sm:$0xff]  ;;  %v1709_v40 = vld [vmem:[%s2082_s0 + $0xe0] ss:$8 sps:$4 sm:$0xff]  }
   0xd   :  { %v1674_v38 = vld [vmem:[%s2082_s0 + $0x34] ss:$8 sps:$4 sm:$0xff]   ;;  %v1613_v39 = vpack.c.bf16 %v747_v36, %v746_v35  ;;  %v748_v41 = vld [vmem:[%s2083_s3 + $0x40] sm:$0xff]  ;;  %v749_v42 = vld [vmem:[%s2083_s3 + $0x48] sm:$0xff] }
   0xe   :  { %v1710_v43 = vld [vmem:[%s2082_s0 + $0xf4] ss:$8 sps:$4 sm:$0xff]   ;;  %v1617_v44 = vpack.c.bf16 %v749_v42, %v748_v41  ;;  %v1676_v47 = vld [vmem:[%s2082_s0 + $0x30] ss:$8 sps:$4 sm:$0xff]   ;;  %v1677_v49 = vld [vmem:[%s2082_s0 + $0x44] ss:$8 sps:$4 sm:$0xff]  }
   0xf   :  { %1368 = vmatpush3.bf16.msra.mxu0 %v1656_v7  ;;  %1644 = vmatpush3.bf16.msra.mxu1 %v1656_v7  ;;  %v750_v45 = vld [vmem:[%s2083_s3 + $0x50] sm:$0xff]  ;;  %v751_v46 = vld [vmem:[%s2083_s3 + $0x58] sm:$0xff]  ;;  %v1679_v51 = vld [vmem:[%s2082_s0 + $0x40] ss:$8 sps:$4 sm:$0xff]  }
  0x10   :  { %1369 = vmatprep.subr.bf16.mxu0 %v1657_v8  ;;  %1637 = vmatprep.subr.bf16.mxu1 %v1657_v8  ;;  %v1621_v48 = vpack.c.bf16 %v751_v46, %v750_v45  ;;  %v1712_v50 = vld [vmem:[%s2082_s0 + $0xf0] ss:$8 sps:$4 sm:$0xff]   ;;  %v1680_v52 = vld [vmem:[%s2082_s0 + $0x54] ss:$8 sps:$4 sm:$0xff]   ;;  %v1683_v54 = vld [vmem:[%s2082_s0 + $0x64] ss:$8 sps:$4 sm:$0xff]  }
  0x11   :  { %v1682_v53 = vld [vmem:[%s2082_s0 + $0x50] ss:$8 sps:$4 sm:$0xff]   ;;  %v1685_v55 = vld [vmem:[%s2082_s0 + $0x60] ss:$8 sps:$4 sm:$0xff]   ;;  %v1686_v56 = vld [vmem:[%s2082_s0 + $0x74] ss:$8 sps:$4 sm:$0xff]  }
  0x12   :  { %v1688_v57 = vld [vmem:[%s2082_s0 + $0x70] ss:$8 sps:$4 sm:$0xff]   ;;  %v1689_v58 = vld [vmem:[%s2082_s0 + $0x84] ss:$8 sps:$4 sm:$0xff]   ;;  %v1691_v59 = vld [vmem:[%s2082_s0 + $0x80] ss:$8 sps:$4 sm:$0xff]  }
  0x13   :  { %1370 = vmatpush3.bf16.msra.mxu0 %v1658_v9  ;;  %1645 = vmatpush3.bf16.msra.mxu1 %v1658_v9  ;;  %v1692_v60 = vld [vmem:[%s2082_s0 + $0x94] ss:$8 sps:$4 sm:$0xff]   ;;  %v1694_v61 = vld [vmem:[%s2082_s0 + $0x90] ss:$8 sps:$4 sm:$0xff]   ;;  %v1698_v62 = vld [vmem:[%s2082_s0 + $0xa4] ss:$8 sps:$4 sm:$0xff]  }
  0x14   :  { %1371 = vmatprep.subr.bf16.mxu0 %v1659_v10  ;;  %1638 = vmatprep.subr.bf16.mxu1 %v1659_v10  ;;  %v1700_v63 = vld [vmem:[%s2082_s0 + $0xa0] ss:$8 sps:$4 sm:$0xff]   ;;  %v1704_v0 = vld [vmem:[%s2082_s0 + $0xb4] ss:$8 sps:$4 sm:$0xff]   ;;  %v1706_v4 = vld [vmem:[%s2082_s0 + $0xb0] ss:$8 sps:$4 sm:$0xff]  }
  0x15   :  { %v752_v1 = vld [vmem:[%s2083_s3 + $0x60] sm:$0xff]  ;;  %v753_v2 = vld [vmem:[%s2083_s3 + $0x68] sm:$0xff]  ;;  %v754_v5 = vld [vmem:[%s2083_s3 + $0x70] sm:$0xff] }
  0x16   :  { %v1625_v3 = vpack.c.bf16 %v753_v2, %v752_v1  ;;  %v755_v6 = vld [vmem:[%s2083_s3 + $0x78] sm:$0xff]  ;;  %v1938_v10 = vld [vmem:[%s2084_s2] ss:$0 sm:$0xff] }
  0x17   :  { %1372 = vmatpush3.bf16.msra.mxu0 %v1660_v12  ;;  %1646 = vmatpush3.bf16.msra.mxu1 %v1660_v12  ;;  %v1629_v7 = vpack.c.bf16 %v755_v6, %v754_v5 }
  0x18   :  { %1373 = vmatprep.subr.bf16.mxu0 %v1661_v13  ;;  %1639 = vmatprep.subr.bf16.mxu1 %v1661_v13 }
  0x1b   :  { %1374 = vmatpush3.bf16.msra.mxu0 %v1662_v14  ;;  %1647 = vmatpush3.bf16.msra.mxu1 %v1662_v14 }
  0x1c   :  { %1375 = vmatprep.subr.bf16.mxu0 %v1663_v15  ;;  %1640 = vmatprep.subr.bf16.mxu1 %v1663_v15 }
  0x1f   :  { %1376 = vmatpush3.bf16.msra.mxu0 %v1664_v16  ;;  %1648 = vmatpush3.bf16.msra.mxu1 %v1664_v16 }
  0x20   :  { %1602 = vmatprep.subr.bf16.mxu1 %v1601_v26 }
  0x22   :  { %442 = vmatmul.mubr.bf16.vlgmr.msra.gmra.mrb[0].mxu0 %v1665_v17  ;;  %538 = vmatmul.mubr.bf16.vlgmr.msra.gmra.mrb[0].mxu1 %v1695_v20 }
  0x23   :  { %449 = vmatprep.mubr.bf16.mxu0 %v1668_v19  ;;  %545 = vmatprep.mubr.bf16.mxu1 %v1701_v21 }
  0x24   :  { %1604 = vmatpush3.bf16.msra.mxu1 %v1601_v26 }
  0x25   :  { %1606 = vmatprep.subr.bf16.mxu1 %v1605_v30 }
  0x28   :  { %1608 = vmatpush3.bf16.msra.mxu1 %v1605_v30 }
  0x29   :  { %1610 = vmatprep.subr.bf16.mxu1 %v1609_v34 }
  0x2a   :  { %450 = vmatmul.mubr.bf16.gmra.mrb[4].mxu0 %v1670_v22  ;;  %546 = vmatmul.mubr.bf16.gmra.mrb[4].mxu1 %v1703_v29 }
  0x2b   :  { %457 = vmatprep.mubr.bf16.mxu0 %v1671_v25  ;;  %553 = vmatprep.mubr.bf16.mxu1 %v1707_v33 }
  0x2c   :  { %1612 = vmatpush3.bf16.msra.mxu1 %v1609_v34 }
  0x2d   :  { %1614 = vmatprep.subr.bf16.mxu1 %v1613_v39 }
  0x30   :  { %1616 = vmatpush3.bf16.msra.mxu1 %v1613_v39 }
  0x31   :  { %1618 = vmatprep.subr.bf16.mxu1 %v1617_v44 }
  0x32   :  { %458 = vmatmul.mubr.bf16.gmra.mrb[8].mxu0 %v1673_v37  ;;  %554 = vmatmul.mubr.bf16.gmra.mrb[8].mxu1 %v1709_v40 }
  0x33   :  { %465 = vmatprep.mubr.bf16.mxu0 %v1674_v38  ;;  %561 = vmatprep.mubr.bf16.mxu1 %v1710_v43 }
  0x34   :  { %1620 = vmatpush3.bf16.msra.mxu1 %v1617_v44 }
  0x35   :  { %1622 = vmatprep.subr.bf16.mxu1 %v1621_v48 }
  0x38   :  { %1624 = vmatpush3.bf16.msra.mxu1 %v1621_v48 }
  0x39   :  { %1626 = vmatprep.subr.bf16.mxu1 %v1625_v3 }
  0x3a   :  { %466 = vmatmul.mubr.bf16.gmra.mrb[12].mxu0 %v1676_v47  ;;  %562 = vmatmul.mubr.bf16.gmra.mrb[12].mxu1 %v1712_v50 }
  0x3b   :  { %473 = vmatprep.mubr.bf16.mxu0 %v1677_v49 }
  0x3c   :  { %1628 = vmatpush3.bf16.msra.mxu1 %v1625_v3 }
  0x3d   :  { %1630 = vmatprep.subr.bf16.mxu1 %v1629_v7 }
  0x40   :  { %1632 = vmatpush3.bf16.msra.mxu1 %v1629_v7 }
  0x42   :  { %474 = vmatmul.mubr.bf16.gmra.mrb[16].mxu0 %v1679_v51 }
  0x43   :  { %481 = vmatprep.mubr.bf16.mxu0 %v1680_v52 }
  0x4a   :  { %482 = vmatmul.mubr.bf16.gmra.mrb[20].mxu0 %v1682_v53 }
  0x4b   :  { %489 = vmatprep.mubr.bf16.mxu0 %v1683_v54 }
  0x52   :  { %490 = vmatmul.mubr.bf16.gmra.mrb[24].mxu0 %v1685_v55 }
  0x53   :  { %497 = vmatprep.mubr.bf16.mxu0 %v1686_v56 }
  0x5a   :  { %498 = vmatmul.mubr.bf16.gmra.mrb[28].mxu0 %v1688_v57 }
  0x5b   :  { %505 = vmatprep.mubr.bf16.mxu0 %v1689_v58 }
  0x62   :  { %506 = vmatmul.mubr.bf16.gmra.mrb[32].mxu0 %v1691_v59 }
  0x63   :  { %513 = vmatprep.mubr.bf16.mxu0 %v1692_v60 }
  0x6a   :  { %514 = vmatmul.mubr.bf16.gmra.mrb[36].mxu0 %v1694_v61 }
  0x6b   :  { %521 = vmatprep.mubr.bf16.mxu0 %v1698_v62 }
  0x72   :  { %522 = vmatmul.mubr.bf16.gmra.mrb[40].mxu0 %v1700_v63 }
  0x73   :  { %529 = vmatprep.mubr.bf16.mxu0 %v1704_v0 }
  0x7a   :  { %530 = vmatmul.mubr.bf16.gmra.mrb[44].mxu0 %v1706_v4 }
  0xf5   :  { %v1377_v8 = vpop.f32.mrb[0].mxu0  ;;  %v1449_v11 = vpop.f32.mrb[0].mxu1 }
  0xf6   :  { %v1378_v9 = vpop.f32.mrb[1].mxu0  ;;  %v1450_v14 = vpop.f32.mrb[1].mxu1 }
  0xf7   :  { %v1379_v12 = vadd.f32 %v1378_v9, %v1377_v8  ;;  %v1380_v13 = vpop.f32.mrb[2].mxu0  ;;  %v1940_v16 = vadd.f32 %v1450_v14, %v1449_v11  ;;  %v1452_v17 = vpop.f32.mrb[2].mxu1 }
  0xf8   :  { %v1381_v15 = vpop.f32.mrb[3].mxu0  ;;  %v1453_v20 = vpop.f32.mrb[3].mxu1 }
  0xf9   :  { %v676_v18 = vadd.f32 %v1379_v12, %v1938_v10  ;;  %v1382_v19 = vadd.f32 %v1381_v15, %v1380_v13  ;;  %v1943_v21 = vadd.f32 %v1453_v20, %v1452_v17 }
  0xfb   :  { %v708_v22 = vmax.f32 %v676_v18, 0.0  ;;  %v677_v23 = vadd.f32 %v1382_v19, %v1938_v10 }
  0xfd   :  { %v709_v24 = vmax.f32 %v677_v23, 0.0  ;;  %v1383_v25 = vpop.f32.mrb[4].mxu0  ;;  %1553 = vmatprep.mubr.f32.mxu1 %v708_v22  ;;  %v1455_v27 = vpop.f32.mrb[4].mxu1 }
  0xfe   :  { %v1384_v26 = vpop.f32.mrb[5].mxu0  ;;  %v1456_v30 = vpop.f32.mrb[5].mxu1 }
  0xff   :  { %v1385_v28 = vadd.f32 %v1384_v26, %v1383_v25  ;;  %v1386_v29 = vpop.f32.mrb[6].mxu0  ;;  %1554 = vmatmul.mubr.f32.vlgmr.msra.gmra.mrb[16].mxu1 %v709_v24  ;;  %v1946_v32 = vadd.f32 %v1456_v30, %v1455_v27  ;;  %v1458_v33 = vpop.f32.mrb[6].mxu1 }
 0x100   :  { %v1387_v31 = vpop.f32.mrb[7].mxu0  ;;  %v1459_v36 = vpop.f32.mrb[7].mxu1 }
 0x101   :  { %v678_v34 = vadd.f32 %v1385_v28, %v1938_v10  ;;  %v1388_v35 = vadd.f32 %v1387_v31, %v1386_v29  ;;  %v1949_v37 = vadd.f32 %v1459_v36, %v1458_v33 }
 0x103   :  { %v710_v38 = vmax.f32 %v678_v34, 0.0  ;;  %v679_v39 = vadd.f32 %v1388_v35, %v1938_v10 }
 0x105   :  { %v711_v40 = vmax.f32 %v679_v39, 0.0  ;;  %v1389_v41 = vpop.f32.mrb[8].mxu0  ;;  %1556 = vmatprep.mubr.f32.mxu1 %v710_v38  ;;  %v1461_v43 = vpop.f32.mrb[8].mxu1 }
 0x106   :  { %v1390_v42 = vpop.f32.mrb[9].mxu0  ;;  %v1462_v46 = vpop.f32.mrb[9].mxu1 }
 0x107   :  { %v1391_v44 = vadd.f32 %v1390_v42, %v1389_v41  ;;  %v1392_v45 = vpop.f32.mrb[10].mxu0  ;;  %1557 = vmatmul.mubr.f32.gmra.mrb[18].mxu1 %v711_v40  ;;  %v1952_v48 = vadd.f32 %v1462_v46, %v1461_v43  ;;  %v1464_v49 = vpop.f32.mrb[10].mxu1 }
 0x108   :  { %v1393_v47 = vpop.f32.mrb[11].mxu0  ;;  %v1465_v52 = vpop.f32.mrb[11].mxu1 }
 0x109   :  { %v680_v50 = vadd.f32 %v1391_v44, %v1938_v10  ;;  %v1394_v51 = vadd.f32 %v1393_v47, %v1392_v45  ;;  %v1955_v53 = vadd.f32 %v1465_v52, %v1464_v49 }
 0x10b   :  { %v712_v54 = vmax.f32 %v680_v50, 0.0  ;;  %v681_v55 = vadd.f32 %v1394_v51, %v1938_v10 }
 0x10d   :  { %v713_v56 = vmax.f32 %v681_v55, 0.0  ;;  %v1395_v57 = vpop.f32.mrb[12].mxu0  ;;  %1559 = vmatprep.mubr.f32.mxu1 %v712_v54  ;;  %v1467_v59 = vpop.f32.mrb[12].mxu1 }
 0x10e   :  { %v1396_v58 = vpop.f32.mrb[13].mxu0  ;;  %v1468_v62 = vpop.f32.mrb[13].mxu1 }
 0x10f   :  { %v1397_v60 = vadd.f32 %v1396_v58, %v1395_v57  ;;  %v1398_v61 = vpop.f32.mrb[14].mxu0  ;;  %1560 = vmatmul.mubr.f32.gmra.mrb[20].mxu1 %v713_v56  ;;  %v1958_v0 = vadd.f32 %v1468_v62, %v1467_v59  ;;  %v1470_v1 = vpop.f32.mrb[14].mxu1 }
 0x110   :  { %v1399_v63 = vpop.f32.mrb[15].mxu0  ;;  %v1471_v4 = vpop.f32.mrb[15].mxu1 }
 0x111   :  { %v682_v2 = vadd.f32 %v1397_v60, %v1938_v10  ;;  %v1400_v3 = vadd.f32 %v1399_v63, %v1398_v61  ;;  %v1961_v5 = vadd.f32 %v1471_v4, %v1470_v1 }
 0x113   :  { %v714_v6 = vmax.f32 %v682_v2, 0.0  ;;  %v683_v7 = vadd.f32 %v1400_v3, %v1938_v10 }
 0x115   :  { %v715_v8 = vmax.f32 %v683_v7, 0.0  ;;  %v1401_v9 = vpop.f32.mrb[16].mxu0  ;;  %1562 = vmatprep.mubr.f32.mxu1 %v714_v6 }
 0x116   :  { %v1402_v11 = vpop.f32.mrb[17].mxu0 }
 0x117   :  { %v1403_v12 = vadd.f32 %v1402_v11, %v1401_v9  ;;  %v1404_v13 = vpop.f32.mrb[18].mxu0  ;;  %1563 = vmatmul.mubr.f32.gmra.mrb[22].mxu1 %v715_v8 }
 0x118   :  { %v1405_v14 = vpop.f32.mrb[19].mxu0 }
 0x119   :  { %v684_v15 = vadd.f32 %v1403_v12, %v1938_v10  ;;  %v1406_v17 = vadd.f32 %v1405_v14, %v1404_v13 }
 0x11b   :  { %v716_v18 = vmax.f32 %v684_v15, 0.0  ;;  %v685_v19 = vadd.f32 %v1406_v17, %v1938_v10 }
 0x11d   :  { %v717_v20 = vmax.f32 %v685_v19, 0.0  ;;  %v1407_v22 = vpop.f32.mrb[20].mxu0  ;;  %1565 = vmatprep.mubr.f32.mxu1 %v716_v18 }
 0x11e   :  { %v1408_v23 = vpop.f32.mrb[21].mxu0 }
 0x11f   :  { %v1409_v24 = vadd.f32 %v1408_v23, %v1407_v22  ;;  %v1410_v25 = vpop.f32.mrb[22].mxu0  ;;  %1566 = vmatmul.mubr.f32.gmra.mrb[24].mxu1 %v717_v20 }
 0x120   :  { %v1411_v26 = vpop.f32.mrb[23].mxu0 }
 0x121   :  { %v686_v27 = vadd.f32 %v1409_v24, %v1938_v10  ;;  %v1412_v28 = vadd.f32 %v1411_v26, %v1410_v25 }
 0x123   :  { %v718_v29 = vmax.f32 %v686_v27, 0.0  ;;  %v687_v30 = vadd.f32 %v1412_v28, %v1938_v10 }
 0x125   :  { %v719_v31 = vmax.f32 %v687_v30, 0.0  ;;  %v1413_v33 = vpop.f32.mrb[24].mxu0  ;;  %1568 = vmatprep.mubr.f32.mxu1 %v718_v29 }
 0x126   :  { %v1414_v34 = vpop.f32.mrb[25].mxu0 }
 0x127   :  { %v1415_v35 = vadd.f32 %v1414_v34, %v1413_v33  ;;  %v1416_v36 = vpop.f32.mrb[26].mxu0  ;;  %1569 = vmatmul.mubr.f32.gmra.mrb[26].mxu1 %v719_v31 }
 0x128   :  { %v1417_v38 = vpop.f32.mrb[27].mxu0 }
 0x129   :  { %v688_v39 = vadd.f32 %v1415_v35, %v1938_v10  ;;  %v1418_v40 = vadd.f32 %v1417_v38, %v1416_v36  ;;  %v700_v35 = vadd.f32 %v1940_v16, %v1938_v10  ;;  %v704_v16 = vadd.f32 %v1952_v48, %v1938_v10 }
 0x12b   :  { %v720_v41 = vmax.f32 %v688_v39, 0.0  ;;  %v689_v42 = vadd.f32 %v1418_v40, %v1938_v10  ;;  %v701_v39 = vadd.f32 %v1943_v21, %v1938_v10  ;;  %v706_v21 = vadd.f32 %v1958_v0, %v1938_v10  ;;  %v1999_v0 = vld [vmem:[%s2085_s4] ss:$0 sm:$0xff] }
 0x12d   :  { %v721_v43 = vmax.f32 %v689_v42, 0.0  ;;  %v1419_v44 = vpop.f32.mrb[28].mxu0  ;;  %1571 = vmatprep.mubr.f32.mxu1 %v720_v41  ;;  %v732_v41 = vmax.f32 %v700_v35, 0.0  ;;  %v702_v42 = vadd.f32 %v1946_v32, %v1938_v10  ;;  %v736_v32 = vmax.f32 %v704_v16, 0.0 }
 0x12e   :  { %v1420_v45 = vpop.f32.mrb[29].mxu0 }
 0x12f   :  { %v1421_v46 = vadd.f32 %v1420_v45, %v1419_v44  ;;  %v1422_v47 = vpop.f32.mrb[30].mxu0  ;;  %1572 = vmatmul.mubr.f32.gmra.mrb[28].mxu1 %v721_v43  ;;  %v733_v43 = vmax.f32 %v701_v39, 0.0  ;;  %v703_v44 = vadd.f32 %v1949_v37, %v1938_v10  ;;  %v734_v45 = vmax.f32 %v702_v42, 0.0 }
 0x130   :  { %v1423_v49 = vpop.f32.mrb[31].mxu0  ;;  %v707_v37 = vadd.f32 %v1961_v5, %v1938_v10 }
 0x131   :  { %v690_v50 = vadd.f32 %v1421_v46, %v1938_v10  ;;  %v1424_v51 = vadd.f32 %v1423_v49, %v1422_v47  ;;  %v735_v46 = vmax.f32 %v703_v44, 0.0  ;;  %v705_v47 = vadd.f32 %v1955_v53, %v1938_v10 }
 0x132   :  { %v738_v49 = vmax.f32 %v706_v21, 0.0  ;;  %v739_v48 = vmax.f32 %v707_v37, 0.0 }
 0x133   :  { %v722_v52 = vmax.f32 %v690_v50, 0.0  ;;  %v691_v54 = vadd.f32 %v1424_v51, %v1938_v10  ;;  %v737_v50 = vmax.f32 %v705_v47, 0.0 }
 0x135   :  { %v723_v55 = vmax.f32 %v691_v54, 0.0  ;;  %v1425_v56 = vpop.f32.mrb[32].mxu0  ;;  %1574 = vmatprep.mubr.f32.mxu1 %v722_v52 }
 0x136   :  { %v1426_v57 = vpop.f32.mrb[33].mxu0 }
 0x137   :  { %v1427_v58 = vadd.f32 %v1426_v57, %v1425_v56  ;;  %v1428_v59 = vpop.f32.mrb[34].mxu0  ;;  %1575 = vmatmul.mubr.f32.gmra.mrb[30].mxu1 %v723_v55 }
 0x138   :  { %v1429_v60 = vpop.f32.mrb[35].mxu0 }
 0x139   :  { %v692_v61 = vadd.f32 %v1427_v58, %v1938_v10  ;;  %v1430_v62 = vadd.f32 %v1429_v60, %v1428_v59 }
 0x13b   :  { %v724_v63 = vmax.f32 %v692_v61, 0.0  ;;  %v693_v1 = vadd.f32 %v1430_v62, %v1938_v10 }
 0x13d   :  { %v725_v2 = vmax.f32 %v693_v1, 0.0  ;;  %v1431_v3 = vpop.f32.mrb[36].mxu0  ;;  %1577 = vmatprep.mubr.f32.mxu1 %v724_v63 }
 0x13e   :  { %v1432_v4 = vpop.f32.mrb[37].mxu0 }
 0x13f   :  { %v1433_v6 = vadd.f32 %v1432_v4, %v1431_v3  ;;  %v1434_v7 = vpop.f32.mrb[38].mxu0  ;;  %1578 = vmatmul.mubr.f32.gmra.mrb[32].mxu1 %v725_v2 }
 0x140   :  { %v1435_v8 = vpop.f32.mrb[39].mxu0 }
 0x141   :  { %v694_v9 = vadd.f32 %v1433_v6, %v1938_v10  ;;  %v1436_v11 = vadd.f32 %v1435_v8, %v1434_v7 }
 0x143   :  { %v726_v12 = vmax.f32 %v694_v9, 0.0  ;;  %v695_v13 = vadd.f32 %v1436_v11, %v1938_v10 }
 0x145   :  { %v727_v14 = vmax.f32 %v695_v13, 0.0  ;;  %v1437_v15 = vpop.f32.mrb[40].mxu0  ;;  %1580 = vmatprep.mubr.f32.mxu1 %v726_v12 }
 0x146   :  { %v1438_v17 = vpop.f32.mrb[41].mxu0 }
 0x147   :  { %v1439_v18 = vadd.f32 %v1438_v17, %v1437_v15  ;;  %v1440_v19 = vpop.f32.mrb[42].mxu0  ;;  %1581 = vmatmul.mubr.f32.gmra.mrb[34].mxu1 %v727_v14 }
 0x148   :  { %v1441_v20 = vpop.f32.mrb[43].mxu0 }
 0x149   :  { %v696_v22 = vadd.f32 %v1439_v18, %v1938_v10  ;;  %v1442_v23 = vadd.f32 %v1441_v20, %v1440_v19 }
 0x14b   :  { %v728_v24 = vmax.f32 %v696_v22, 0.0  ;;  %v697_v25 = vadd.f32 %v1442_v23, %v1938_v10 }
 0x14d   :  { %v729_v26 = vmax.f32 %v697_v25, 0.0  ;;  %v1443_v27 = vpop.f32.mrb[44].mxu0  ;;  %1583 = vmatprep.mubr.f32.mxu1 %v728_v24 }
 0x14e   :  { %v1444_v28 = vpop.f32.mrb[45].mxu0 }
 0x14f   :  { %v1445_v29 = vadd.f32 %v1444_v28, %v1443_v27  ;;  %v1446_v30 = vpop.f32.mrb[46].mxu0  ;;  %1584 = vmatmul.mubr.f32.gmra.mrb[36].mxu1 %v729_v26 }
 0x150   :  { %v1447_v31 = vpop.f32.mrb[47].mxu0 }
 0x151   :  { %v698_v33 = vadd.f32 %v1445_v29, %v1938_v10  ;;  %v1448_v34 = vadd.f32 %v1447_v31, %v1446_v30 }
 0x153   :  { %v730_v36 = vmax.f32 %v698_v33, 0.0  ;;  %v699_v38 = vadd.f32 %v1448_v34, %v1938_v10 }
 0x155   :  { %v731_v40 = vmax.f32 %v699_v38, 0.0  ;;  %1586 = vmatprep.mubr.f32.mxu1 %v730_v36 }
 0x157   :  { %1587 = vmatmul.mubr.f32.gmra.mrb[38].mxu1 %v731_v40 }
 0x158   :  { %1589 = vmatprep.mubr.f32.mxu1 %v732_v41 }
 0x15b   :  { %1590 = vmatmul.mubr.f32.gmra.mrb[40].mxu1 %v733_v43 }
 0x15c   :  { %1592 = vmatprep.mubr.f32.mxu1 %v734_v45 }
 0x15f   :  { %1593 = vmatmul.mubr.f32.gmra.mrb[42].mxu1 %v735_v46 }
 0x160   :  { %1595 = vmatprep.mubr.f32.mxu1 %v736_v32 }
 0x163   :  { %1596 = vmatmul.mubr.f32.gmra.mrb[44].mxu1 %v737_v50 }
 0x164   :  { %1598 = vmatprep.mubr.f32.mxu1 %v738_v49 }
 0x167   :  { %1599 = vmatmul.mubr.f32.gmra.mrb[46].mxu1 %v739_v48 }
 0x1d2   :  { %v1555_v51 = vpop.f32.mrb[16].mxu1 }
 0x1d3   :  { %v835_v53 = vadd.f32 %v1555_v51, %v1999_v0  ;;  %v829_v52 = vpop.f32.mrb[17].mxu1 }
 0x1d4   :  { %v830_v54 = vadd.f32 %v1999_v0, %v829_v52 }
 0x1d6   :  { %v1269_v55 = vpack.c.bf16 %v835_v53, %v830_v54 }
 0x1d8   :  { %1270 = vst [vmem:[%s2086_s5] sm:$0xff] %v1269_v55  }
 0x1da   :  { %v1558_v10 = vpop.f32.mrb[18].mxu1 }
 0x1db   :  { %v845_v5 = vadd.f32 %v1558_v10, %v1999_v0  ;;  %v839_v56 = vpop.f32.mrb[19].mxu1 }
 0x1dc   :  { %v840_v57 = vadd.f32 %v1999_v0, %v839_v56 }
 0x1de   :  { %v1274_v58 = vpack.c.bf16 %v845_v5, %v840_v57 }
 0x1e0   :  { %1346 = vst [vmem:[%s2086_s5 + $0x8] sm:$0xff] %v1274_v58  }
 0x1e2   :  { %v1561_v59 = vpop.f32.mrb[20].mxu1 }
 0x1e3   :  { %v855_v60 = vadd.f32 %v1561_v59, %v1999_v0  ;;  %v849_v61 = vpop.f32.mrb[21].mxu1 }
 0x1e4   :  { %v850_v62 = vadd.f32 %v1999_v0, %v849_v61 }
 0x1e6   :  { %v1279_v63 = vpack.c.bf16 %v855_v60, %v850_v62 }
 0x1e8   :  { %1347 = vst [vmem:[%s2086_s5 + $0x10] sm:$0xff] %v1279_v63  }
 0x1ea   :  { %v1564_v1 = vpop.f32.mrb[22].mxu1 }
 0x1eb   :  { %v865_v2 = vadd.f32 %v1564_v1, %v1999_v0  ;;  %v859_v3 = vpop.f32.mrb[23].mxu1 }
 0x1ec   :  { %v860_v4 = vadd.f32 %v1999_v0, %v859_v3 }
 0x1ee   :  { %v1284_v6 = vpack.c.bf16 %v865_v2, %v860_v4 }
 0x1f0   :  { %1348 = vst [vmem:[%s2086_s5 + $0x18] sm:$0xff] %v1284_v6  }
 0x1f2   :  { %v1567_v7 = vpop.f32.mrb[24].mxu1 }
 0x1f3   :  { %v875_v8 = vadd.f32 %v1567_v7, %v1999_v0  ;;  %v869_v9 = vpop.f32.mrb[25].mxu1 }
 0x1f4   :  { %v870_v11 = vadd.f32 %v1999_v0, %v869_v9 }
 0x1f6   :  { %v1289_v12 = vpack.c.bf16 %v875_v8, %v870_v11 }
 0x1f8   :  { %1349 = vst [vmem:[%s2086_s5 + $0x20] sm:$0xff] %v1289_v12  }
 0x1fa   :  { %v1570_v13 = vpop.f32.mrb[26].mxu1 }
 0x1fb   :  { %v885_v14 = vadd.f32 %v1570_v13, %v1999_v0  ;;  %v879_v15 = vpop.f32.mrb[27].mxu1 }
 0x1fc   :  { %v880_v17 = vadd.f32 %v1999_v0, %v879_v15 }
 0x1fe   :  { %v1294_v18 = vpack.c.bf16 %v885_v14, %v880_v17 }
 0x200   :  { %1350 = vst [vmem:[%s2086_s5 + $0x28] sm:$0xff] %v1294_v18  }
 0x202   :  { %v1573_v19 = vpop.f32.mrb[28].mxu1 }
 0x203   :  { %v895_v20 = vadd.f32 %v1573_v19, %v1999_v0  ;;  %v889_v22 = vpop.f32.mrb[29].mxu1 }
 0x204   :  { %v890_v23 = vadd.f32 %v1999_v0, %v889_v22 }
 0x206   :  { %v1299_v24 = vpack.c.bf16 %v895_v20, %v890_v23 }
 0x208   :  { %1351 = vst [vmem:[%s2086_s5 + $0x30] sm:$0xff] %v1299_v24  }
 0x20a   :  { %v1576_v25 = vpop.f32.mrb[30].mxu1 }
 0x20b   :  { %v905_v26 = vadd.f32 %v1576_v25, %v1999_v0  ;;  %v899_v27 = vpop.f32.mrb[31].mxu1 }
 0x20c   :  { %v900_v28 = vadd.f32 %v1999_v0, %v899_v27 }
 0x20e   :  { %v1304_v29 = vpack.c.bf16 %v905_v26, %v900_v28 }
 0x210   :  { %1352 = vst [vmem:[%s2086_s5 + $0x38] sm:$0xff] %v1304_v29  }
 0x212   :  { %v1579_v30 = vpop.f32.mrb[32].mxu1 }
 0x213   :  { %v915_v31 = vadd.f32 %v1579_v30, %v1999_v0  ;;  %v909_v33 = vpop.f32.mrb[33].mxu1 }
 0x214   :  { %v910_v34 = vadd.f32 %v1999_v0, %v909_v33 }
 0x216   :  { %v1309_v35 = vpack.c.bf16 %v915_v31, %v910_v34 }
 0x218   :  { %1353 = vst [vmem:[%s2086_s5 + $0x40] sm:$0xff] %v1309_v35  }
 0x21a   :  { %v1582_v36 = vpop.f32.mrb[34].mxu1 }
 0x21b   :  { %v925_v38 = vadd.f32 %v1582_v36, %v1999_v0  ;;  %v919_v39 = vpop.f32.mrb[35].mxu1 }
 0x21c   :  { %v920_v40 = vadd.f32 %v1999_v0, %v919_v39 }
 0x21e   :  { %v1314_v41 = vpack.c.bf16 %v925_v38, %v920_v40 }
 0x220   :  { %1354 = vst [vmem:[%s2086_s5 + $0x48] sm:$0xff] %v1314_v41  }
 0x222   :  { %v1585_v42 = vpop.f32.mrb[36].mxu1 }
 0x223   :  { %v935_v43 = vadd.f32 %v1585_v42, %v1999_v0  ;;  %v929_v44 = vpop.f32.mrb[37].mxu1 }
 0x224   :  { %v930_v45 = vadd.f32 %v1999_v0, %v929_v44 }
 0x226   :  { %v1319_v16 = vpack.c.bf16 %v935_v43, %v930_v45 }
 0x228   :  { %1355 = vst [vmem:[%s2086_s5 + $0x50] sm:$0xff] %v1319_v16  }
 0x22a   :  { %v1588_v21 = vpop.f32.mrb[38].mxu1 }
 0x22b   :  { %v945_v46 = vadd.f32 %v1588_v21, %v1999_v0  ;;  %v939_v47 = vpop.f32.mrb[39].mxu1 }
 0x22c   :  { %v940_v32 = vadd.f32 %v1999_v0, %v939_v47 }
 0x22e   :  { %v1324_v49 = vpack.c.bf16 %v945_v46, %v940_v32  ;;  %v1591_v50 = vpop.f32.mrb[40].mxu1 }
 0x22f   :  { %v955_v37 = vadd.f32 %v1591_v50, %v1999_v0  ;;  %v949_v48 = vpop.f32.mrb[41].mxu1 }
 0x230   :  { %1356 = vst [vmem:[%s2086_s5 + $0x58] sm:$0xff] %v1324_v49   ;;  %v950_v51 = vadd.f32 %v1999_v0, %v949_v48 }
 0x232   :  { %v1329_v53 = vpack.c.bf16 %v955_v37, %v950_v51  ;;  %v1594_v52 = vpop.f32.mrb[42].mxu1 }
 0x233   :  { %v965_v54 = vadd.f32 %v1594_v52, %v1999_v0  ;;  %v959_v55 = vpop.f32.mrb[43].mxu1 }
 0x234   :  { %1357 = vst [vmem:[%s2086_s5 + $0x60] sm:$0xff] %v1329_v53   ;;  %v960_v10 = vadd.f32 %v1999_v0, %v959_v55 }
 0x236   :  { %v1334_v5 = vpack.c.bf16 %v965_v54, %v960_v10  ;;  %v1597_v56 = vpop.f32.mrb[44].mxu1 }
 0x237   :  { %v975_v57 = vadd.f32 %v1597_v56, %v1999_v0  ;;  %v969_v58 = vpop.f32.mrb[45].mxu1 }
 0x238   :  { %1358 = vst [vmem:[%s2086_s5 + $0x68] sm:$0xff] %v1334_v5   ;;  %v970_v59 = vadd.f32 %v1999_v0, %v969_v58 }
 0x23a   :  { %v1339_v60 = vpack.c.bf16 %v975_v57, %v970_v59  ;;  %v1600_v61 = vpop.f32.mrb[46].mxu1 }
 0x23b   :  { %v985_v62 = vadd.f32 %v1600_v61, %v1999_v0  ;;  %v979_v63 = vpop.f32.mrb[47].mxu1 }
 0x23c   :  { %1359 = vst [vmem:[%s2086_s5 + $0x70] sm:$0xff] %v1339_v60   ;;  %v980_v1 = vadd.f32 %v1999_v0, %v979_v63 }
 0x23e   :  { %v1344_v2 = vpack.c.bf16 %v985_v62, %v980_v1 }
 0x240   :  { %1360 = vst [vmem:[%s2086_s5 + $0x78] sm:$0xff] %v1344_v2  }

// kernel: gcn2layer_forward.5
= control target key start
LH: loop header
LB: loop body
LE: loop exit
PB: predicated region body
PF: predicated region fallthrough
CT: control target
= control target key end

     0   :  { %s2648_s1 = inlined_call_operand.vmem [shape: bf16[256,128], index: 1, kind: input, shape index: {}]   ;;  %s2649_s0 = inlined_call_operand.vmem [shape: bf16[256,256], index: 0, kind: input, shape index: {}]   ;;  %s2650_s3 = inlined_call_operand.vmem [shape: f32[128,128], index: 3, kind: input, shape index: {}]   ;;  %s2651_s2 = inlined_call_operand.vmem [shape: f32[1,128], index: 2, kind: input, shape index: {}]   ;;  %s2652_s4 = inlined_call_operand.vmem [shape: f32[1,128], index: 4, kind: input, shape index: {}]   ;;  %s2653_s5 = inlined_call_operand.vmem [shape: f32[256,128], index: 5, kind: output, shape index: {}]  }
   0x1   :  { %v1717_v0 = vld [vmem:[%s2648_s1 + $0x40] sm:$0xff]   ;;  %v1719_v2 = vld [vmem:[%s2648_s1 + $0x48] sm:$0xff]   ;;  %v1721_v4 = vld [vmem:[%s2648_s1 + $0x50] sm:$0xff]  }
   0x2   :  { %v1718_v1 = vld [vmem:[%s2648_s1] sm:$0xff]   ;;  %1429 = vmatprep.subr.bf16.mxu0 %v1717_v0  ;;  %1701 = vmatprep.subr.bf16.mxu1 %v1717_v0  ;;  %v1720_v3 = vld [vmem:[%s2648_s1 + $0x8] sm:$0xff]   ;;  %v1722_v5 = vld [vmem:[%s2648_s1 + $0x10] sm:$0xff]  }
   0x3   :  { %1430 = vmatpush3.bf16.msra.mxu0 %v1718_v1  ;;  %1709 = vmatpush3.bf16.msra.mxu1 %v1718_v1  ;;  %v1723_v6 = vld [vmem:[%s2648_s1 + $0x58] sm:$0xff]   ;;  %v1725_v8 = vld [vmem:[%s2648_s1 + $0x60] sm:$0xff]   ;;  %v1727_v10 = vld [vmem:[%s2648_s1 + $0x68] sm:$0xff]  }
   0x4   :  { %1431 = vmatprep.subr.bf16.mxu0 %v1719_v2  ;;  %1702 = vmatprep.subr.bf16.mxu1 %v1719_v2  ;;  %v1724_v7 = vld [vmem:[%s2648_s1 + $0x18] sm:$0xff]   ;;  %v1726_v9 = vld [vmem:[%s2648_s1 + $0x20] sm:$0xff]   ;;  %v1728_v12 = vld [vmem:[%s2648_s1 + $0x28] sm:$0xff]  }
   0x5   :  { %v1735_v11 = vld [vmem:[%s2649_s0 + $0x4] ss:$8 sps:$4 sm:$0xff]   ;;  %v1729_v13 = vld [vmem:[%s2648_s1 + $0x70] sm:$0xff]   ;;  %v1731_v15 = vld [vmem:[%s2648_s1 + $0x78] sm:$0xff]  }
   0x6   :  { %441 = vmatprep.mubr.bf16.mxu0 %v1735_v11  ;;  %v1730_v14 = vld [vmem:[%s2648_s1 + $0x30] sm:$0xff]   ;;  %v1732_v16 = vld [vmem:[%s2648_s1 + $0x38] sm:$0xff]   ;;  %v1733_v17 = vld [vmem:[%s2649_s0] ss:$8 sps:$4 sm:$0xff]  }
   0x7   :  { %1432 = vmatpush3.bf16.msra.mxu0 %v1720_v3  ;;  %1710 = vmatpush3.bf16.msra.mxu1 %v1720_v3  ;;  %v1765_v18 = vld [vmem:[%s2649_s0 + $0xc4] ss:$8 sps:$4 sm:$0xff]   ;;  %v1736_v19 = vld [vmem:[%s2649_s0 + $0x14] ss:$8 sps:$4 sm:$0xff]   ;;  %v1763_v20 = vld [vmem:[%s2649_s0 + $0xc0] ss:$8 sps:$4 sm:$0xff]  }
   0x8   :  { %1433 = vmatprep.subr.bf16.mxu0 %v1721_v4  ;;  %1703 = vmatprep.subr.bf16.mxu1 %v1721_v4  ;;  %v1769_v21 = vld [vmem:[%s2649_s0 + $0xd4] ss:$8 sps:$4 sm:$0xff]   ;;  %v1738_v22 = vld [vmem:[%s2649_s0 + $0x10] ss:$8 sps:$4 sm:$0xff]   ;;  %v740_v23 = vld [vmem:[%s2650_s3] sm:$0xff] }
   0x9   :  { %537 = vmatprep.mubr.bf16.mxu1 %v1765_v18  ;;  %v741_v24 = vld [vmem:[%s2650_s3 + $0x8] sm:$0xff]  ;;  %v742_v27 = vld [vmem:[%s2650_s3 + $0x10] sm:$0xff]  ;;  %v743_v28 = vld [vmem:[%s2650_s3 + $0x18] sm:$0xff] }
   0xa   :  { %v1739_v25 = vld [vmem:[%s2649_s0 + $0x24] ss:$8 sps:$4 sm:$0xff]   ;;  %v1669_v26 = vpack.c.bf16 %v741_v24, %v740_v23  ;;  %v1771_v29 = vld [vmem:[%s2649_s0 + $0xd0] ss:$8 sps:$4 sm:$0xff]   ;;  %v1673_v30 = vpack.c.bf16 %v743_v28, %v742_v27  ;;  %v1741_v37 = vld [vmem:[%s2649_s0 + $0x20] ss:$8 sps:$4 sm:$0xff]  }
   0xb   :  { %1434 = vmatpush3.bf16.msra.mxu0 %v1722_v5  ;;  %1711 = vmatpush3.bf16.msra.mxu1 %v1722_v5  ;;  %v744_v31 = vld [vmem:[%s2650_s3 + $0x20] sm:$0xff]  ;;  %v745_v32 = vld [vmem:[%s2650_s3 + $0x28] sm:$0xff]  ;;  %v746_v35 = vld [vmem:[%s2650_s3 + $0x30] sm:$0xff] }
   0xc   :  { %1435 = vmatprep.subr.bf16.mxu0 %v1723_v6  ;;  %1704 = vmatprep.subr.bf16.mxu1 %v1723_v6  ;;  %v1775_v33 = vld [vmem:[%s2649_s0 + $0xe4] ss:$8 sps:$4 sm:$0xff]   ;;  %v1677_v34 = vpack.c.bf16 %v745_v32, %v744_v31  ;;  %v747_v36 = vld [vmem:[%s2650_s3 + $0x38] sm:$0xff]  ;;  %v1777_v40 = vld [vmem:[%s2649_s0 + $0xe0] ss:$8 sps:$4 sm:$0xff]  }
   0xd   :  { %v1742_v38 = vld [vmem:[%s2649_s0 + $0x34] ss:$8 sps:$4 sm:$0xff]   ;;  %v1681_v39 = vpack.c.bf16 %v747_v36, %v746_v35  ;;  %v748_v41 = vld [vmem:[%s2650_s3 + $0x40] sm:$0xff]  ;;  %v749_v42 = vld [vmem:[%s2650_s3 + $0x48] sm:$0xff] }
   0xe   :  { %v1778_v43 = vld [vmem:[%s2649_s0 + $0xf4] ss:$8 sps:$4 sm:$0xff]   ;;  %v1685_v44 = vpack.c.bf16 %v749_v42, %v748_v41  ;;  %v1744_v47 = vld [vmem:[%s2649_s0 + $0x30] ss:$8 sps:$4 sm:$0xff]   ;;  %v1745_v49 = vld [vmem:[%s2649_s0 + $0x44] ss:$8 sps:$4 sm:$0xff]  }
   0xf   :  { %1436 = vmatpush3.bf16.msra.mxu0 %v1724_v7  ;;  %1712 = vmatpush3.bf16.msra.mxu1 %v1724_v7  ;;  %v750_v45 = vld [vmem:[%s2650_s3 + $0x50] sm:$0xff]  ;;  %v751_v46 = vld [vmem:[%s2650_s3 + $0x58] sm:$0xff]  ;;  %v1747_v51 = vld [vmem:[%s2649_s0 + $0x40] ss:$8 sps:$4 sm:$0xff]  }
  0x10   :  { %1437 = vmatprep.subr.bf16.mxu0 %v1725_v8  ;;  %1705 = vmatprep.subr.bf16.mxu1 %v1725_v8  ;;  %v1689_v48 = vpack.c.bf16 %v751_v46, %v750_v45  ;;  %v1780_v50 = vld [vmem:[%s2649_s0 + $0xf0] ss:$8 sps:$4 sm:$0xff]   ;;  %v1748_v52 = vld [vmem:[%s2649_s0 + $0x54] ss:$8 sps:$4 sm:$0xff]   ;;  %v1751_v54 = vld [vmem:[%s2649_s0 + $0x64] ss:$8 sps:$4 sm:$0xff]  }
  0x11   :  { %v1750_v53 = vld [vmem:[%s2649_s0 + $0x50] ss:$8 sps:$4 sm:$0xff]   ;;  %v1753_v55 = vld [vmem:[%s2649_s0 + $0x60] ss:$8 sps:$4 sm:$0xff]   ;;  %v1754_v56 = vld [vmem:[%s2649_s0 + $0x74] ss:$8 sps:$4 sm:$0xff]  }
  0x12   :  { %v1756_v57 = vld [vmem:[%s2649_s0 + $0x70] ss:$8 sps:$4 sm:$0xff]   ;;  %v1757_v58 = vld [vmem:[%s2649_s0 + $0x84] ss:$8 sps:$4 sm:$0xff]   ;;  %v1759_v59 = vld [vmem:[%s2649_s0 + $0x80] ss:$8 sps:$4 sm:$0xff]  }
  0x13   :  { %1438 = vmatpush3.bf16.msra.mxu0 %v1726_v9  ;;  %1713 = vmatpush3.bf16.msra.mxu1 %v1726_v9  ;;  %v1760_v60 = vld [vmem:[%s2649_s0 + $0x94] ss:$8 sps:$4 sm:$0xff]   ;;  %v1762_v61 = vld [vmem:[%s2649_s0 + $0x90] ss:$8 sps:$4 sm:$0xff]   ;;  %v1766_v62 = vld [vmem:[%s2649_s0 + $0xa4] ss:$8 sps:$4 sm:$0xff]  }
  0x14   :  { %1439 = vmatprep.subr.bf16.mxu0 %v1727_v10  ;;  %1706 = vmatprep.subr.bf16.mxu1 %v1727_v10  ;;  %v1768_v63 = vld [vmem:[%s2649_s0 + $0xa0] ss:$8 sps:$4 sm:$0xff]   ;;  %v1772_v0 = vld [vmem:[%s2649_s0 + $0xb4] ss:$8 sps:$4 sm:$0xff]   ;;  %v1774_v4 = vld [vmem:[%s2649_s0 + $0xb0] ss:$8 sps:$4 sm:$0xff]  }
  0x15   :  { %v752_v1 = vld [vmem:[%s2650_s3 + $0x60] sm:$0xff]  ;;  %v753_v2 = vld [vmem:[%s2650_s3 + $0x68] sm:$0xff]  ;;  %v754_v5 = vld [vmem:[%s2650_s3 + $0x70] sm:$0xff] }
  0x16   :  { %v1693_v3 = vpack.c.bf16 %v753_v2, %v752_v1  ;;  %v755_v6 = vld [vmem:[%s2650_s3 + $0x78] sm:$0xff]  ;;  %v2134_v10 = vld [vmem:[%s2651_s2] ss:$0 sm:$0xff] }
  0x17   :  { %1440 = vmatpush3.bf16.msra.mxu0 %v1728_v12  ;;  %1714 = vmatpush3.bf16.msra.mxu1 %v1728_v12  ;;  %v1697_v7 = vpack.c.bf16 %v755_v6, %v754_v5 }
  0x18   :  { %1441 = vmatprep.subr.bf16.mxu0 %v1729_v13  ;;  %1707 = vmatprep.subr.bf16.mxu1 %v1729_v13 }
  0x1b   :  { %1442 = vmatpush3.bf16.msra.mxu0 %v1730_v14  ;;  %1715 = vmatpush3.bf16.msra.mxu1 %v1730_v14 }
  0x1c   :  { %1443 = vmatprep.subr.bf16.mxu0 %v1731_v15  ;;  %1708 = vmatprep.subr.bf16.mxu1 %v1731_v15 }
  0x1f   :  { %1444 = vmatpush3.bf16.msra.mxu0 %v1732_v16  ;;  %1716 = vmatpush3.bf16.msra.mxu1 %v1732_v16 }
  0x20   :  { %1670 = vmatprep.subr.bf16.mxu1 %v1669_v26 }
  0x22   :  { %442 = vmatmul.mubr.bf16.vlgmr.msra.gmra.mrb[0].mxu0 %v1733_v17  ;;  %538 = vmatmul.mubr.bf16.vlgmr.msra.gmra.mrb[0].mxu1 %v1763_v20 }
  0x23   :  { %449 = vmatprep.mubr.bf16.mxu0 %v1736_v19  ;;  %545 = vmatprep.mubr.bf16.mxu1 %v1769_v21 }
  0x24   :  { %1672 = vmatpush3.bf16.msra.mxu1 %v1669_v26 }
  0x25   :  { %1674 = vmatprep.subr.bf16.mxu1 %v1673_v30 }
  0x28   :  { %1676 = vmatpush3.bf16.msra.mxu1 %v1673_v30 }
  0x29   :  { %1678 = vmatprep.subr.bf16.mxu1 %v1677_v34 }
  0x2a   :  { %450 = vmatmul.mubr.bf16.gmra.mrb[4].mxu0 %v1738_v22  ;;  %546 = vmatmul.mubr.bf16.gmra.mrb[4].mxu1 %v1771_v29 }
  0x2b   :  { %457 = vmatprep.mubr.bf16.mxu0 %v1739_v25  ;;  %553 = vmatprep.mubr.bf16.mxu1 %v1775_v33 }
  0x2c   :  { %1680 = vmatpush3.bf16.msra.mxu1 %v1677_v34 }
  0x2d   :  { %1682 = vmatprep.subr.bf16.mxu1 %v1681_v39 }
  0x30   :  { %1684 = vmatpush3.bf16.msra.mxu1 %v1681_v39 }
  0x31   :  { %1686 = vmatprep.subr.bf16.mxu1 %v1685_v44 }
  0x32   :  { %458 = vmatmul.mubr.bf16.gmra.mrb[8].mxu0 %v1741_v37  ;;  %554 = vmatmul.mubr.bf16.gmra.mrb[8].mxu1 %v1777_v40 }
  0x33   :  { %465 = vmatprep.mubr.bf16.mxu0 %v1742_v38  ;;  %561 = vmatprep.mubr.bf16.mxu1 %v1778_v43 }
  0x34   :  { %1688 = vmatpush3.bf16.msra.mxu1 %v1685_v44 }
  0x35   :  { %1690 = vmatprep.subr.bf16.mxu1 %v1689_v48 }
  0x38   :  { %1692 = vmatpush3.bf16.msra.mxu1 %v1689_v48 }
  0x39   :  { %1694 = vmatprep.subr.bf16.mxu1 %v1693_v3 }
  0x3a   :  { %466 = vmatmul.mubr.bf16.gmra.mrb[12].mxu0 %v1744_v47  ;;  %562 = vmatmul.mubr.bf16.gmra.mrb[12].mxu1 %v1780_v50 }
  0x3b   :  { %473 = vmatprep.mubr.bf16.mxu0 %v1745_v49 }
  0x3c   :  { %1696 = vmatpush3.bf16.msra.mxu1 %v1693_v3 }
  0x3d   :  { %1698 = vmatprep.subr.bf16.mxu1 %v1697_v7 }
  0x40   :  { %1700 = vmatpush3.bf16.msra.mxu1 %v1697_v7 }
  0x42   :  { %474 = vmatmul.mubr.bf16.gmra.mrb[16].mxu0 %v1747_v51 }
  0x43   :  { %481 = vmatprep.mubr.bf16.mxu0 %v1748_v52 }
  0x4a   :  { %482 = vmatmul.mubr.bf16.gmra.mrb[20].mxu0 %v1750_v53 }
  0x4b   :  { %489 = vmatprep.mubr.bf16.mxu0 %v1751_v54 }
  0x52   :  { %490 = vmatmul.mubr.bf16.gmra.mrb[24].mxu0 %v1753_v55 }
  0x53   :  { %497 = vmatprep.mubr.bf16.mxu0 %v1754_v56 }
  0x5a   :  { %498 = vmatmul.mubr.bf16.gmra.mrb[28].mxu0 %v1756_v57 }
  0x5b   :  { %505 = vmatprep.mubr.bf16.mxu0 %v1757_v58 }
  0x62   :  { %506 = vmatmul.mubr.bf16.gmra.mrb[32].mxu0 %v1759_v59 }
  0x63   :  { %513 = vmatprep.mubr.bf16.mxu0 %v1760_v60 }
  0x6a   :  { %514 = vmatmul.mubr.bf16.gmra.mrb[36].mxu0 %v1762_v61 }
  0x6b   :  { %521 = vmatprep.mubr.bf16.mxu0 %v1766_v62 }
  0x72   :  { %522 = vmatmul.mubr.bf16.gmra.mrb[40].mxu0 %v1768_v63 }
  0x73   :  { %529 = vmatprep.mubr.bf16.mxu0 %v1772_v0 }
  0x7a   :  { %530 = vmatmul.mubr.bf16.gmra.mrb[44].mxu0 %v1774_v4 }
  0xf5   :  { %v1445_v8 = vpop.f32.mrb[0].mxu0  ;;  %v1517_v11 = vpop.f32.mrb[0].mxu1 }
  0xf6   :  { %v1446_v9 = vpop.f32.mrb[1].mxu0  ;;  %v1518_v14 = vpop.f32.mrb[1].mxu1 }
  0xf7   :  { %v1447_v12 = vadd.f32 %v1446_v9, %v1445_v8  ;;  %v1448_v13 = vpop.f32.mrb[2].mxu0  ;;  %v2136_v16 = vadd.f32 %v1518_v14, %v1517_v11  ;;  %v1520_v17 = vpop.f32.mrb[2].mxu1 }
  0xf8   :  { %v1449_v15 = vpop.f32.mrb[3].mxu0  ;;  %v1521_v20 = vpop.f32.mrb[3].mxu1 }
  0xf9   :  { %v676_v18 = vadd.f32 %v1447_v12, %v2134_v10  ;;  %v1450_v19 = vadd.f32 %v1449_v15, %v1448_v13  ;;  %v2139_v21 = vadd.f32 %v1521_v20, %v1520_v17 }
  0xfb   :  { %v708_v22 = vmax.f32 %v676_v18, 0.0  ;;  %v677_v23 = vadd.f32 %v1450_v19, %v2134_v10 }
  0xfd   :  { %v709_v24 = vmax.f32 %v677_v23, 0.0  ;;  %v1451_v25 = vpop.f32.mrb[4].mxu0  ;;  %1621 = vmatprep.mubr.f32.mxu1 %v708_v22  ;;  %v1523_v27 = vpop.f32.mrb[4].mxu1 }
  0xfe   :  { %v1452_v26 = vpop.f32.mrb[5].mxu0  ;;  %v1524_v30 = vpop.f32.mrb[5].mxu1 }
  0xff   :  { %v1453_v28 = vadd.f32 %v1452_v26, %v1451_v25  ;;  %v1454_v29 = vpop.f32.mrb[6].mxu0  ;;  %1622 = vmatmul.mubr.f32.vlgmr.msra.gmra.mrb[16].mxu1 %v709_v24  ;;  %v2142_v32 = vadd.f32 %v1524_v30, %v1523_v27  ;;  %v1526_v33 = vpop.f32.mrb[6].mxu1 }
 0x100   :  { %v1455_v31 = vpop.f32.mrb[7].mxu0  ;;  %v1527_v36 = vpop.f32.mrb[7].mxu1 }
 0x101   :  { %v678_v34 = vadd.f32 %v1453_v28, %v2134_v10  ;;  %v1456_v35 = vadd.f32 %v1455_v31, %v1454_v29  ;;  %v2145_v37 = vadd.f32 %v1527_v36, %v1526_v33 }
 0x103   :  { %v710_v38 = vmax.f32 %v678_v34, 0.0  ;;  %v679_v39 = vadd.f32 %v1456_v35, %v2134_v10 }
 0x105   :  { %v711_v40 = vmax.f32 %v679_v39, 0.0  ;;  %v1457_v41 = vpop.f32.mrb[8].mxu0  ;;  %1624 = vmatprep.mubr.f32.mxu1 %v710_v38  ;;  %v1529_v43 = vpop.f32.mrb[8].mxu1 }
 0x106   :  { %v1458_v42 = vpop.f32.mrb[9].mxu0  ;;  %v1530_v46 = vpop.f32.mrb[9].mxu1 }
 0x107   :  { %v1459_v44 = vadd.f32 %v1458_v42, %v1457_v41  ;;  %v1460_v45 = vpop.f32.mrb[10].mxu0  ;;  %1625 = vmatmul.mubr.f32.gmra.mrb[18].mxu1 %v711_v40  ;;  %v2148_v48 = vadd.f32 %v1530_v46, %v1529_v43  ;;  %v1532_v49 = vpop.f32.mrb[10].mxu1 }
 0x108   :  { %v1461_v47 = vpop.f32.mrb[11].mxu0  ;;  %v1533_v52 = vpop.f32.mrb[11].mxu1 }
 0x109   :  { %v680_v50 = vadd.f32 %v1459_v44, %v2134_v10  ;;  %v1462_v51 = vadd.f32 %v1461_v47, %v1460_v45  ;;  %v2151_v53 = vadd.f32 %v1533_v52, %v1532_v49 }
 0x10b   :  { %v712_v54 = vmax.f32 %v680_v50, 0.0  ;;  %v681_v55 = vadd.f32 %v1462_v51, %v2134_v10 }
 0x10d   :  { %v713_v56 = vmax.f32 %v681_v55, 0.0  ;;  %v1463_v57 = vpop.f32.mrb[12].mxu0  ;;  %1627 = vmatprep.mubr.f32.mxu1 %v712_v54  ;;  %v1535_v59 = vpop.f32.mrb[12].mxu1 }
 0x10e   :  { %v1464_v58 = vpop.f32.mrb[13].mxu0  ;;  %v1536_v62 = vpop.f32.mrb[13].mxu1 }
 0x10f   :  { %v1465_v60 = vadd.f32 %v1464_v58, %v1463_v57  ;;  %v1466_v61 = vpop.f32.mrb[14].mxu0  ;;  %1628 = vmatmul.mubr.f32.gmra.mrb[20].mxu1 %v713_v56  ;;  %v2154_v0 = vadd.f32 %v1536_v62, %v1535_v59  ;;  %v1538_v1 = vpop.f32.mrb[14].mxu1 }
 0x110   :  { %v1467_v63 = vpop.f32.mrb[15].mxu0  ;;  %v1539_v4 = vpop.f32.mrb[15].mxu1 }
 0x111   :  { %v682_v2 = vadd.f32 %v1465_v60, %v2134_v10  ;;  %v1468_v3 = vadd.f32 %v1467_v63, %v1466_v61  ;;  %v2157_v5 = vadd.f32 %v1539_v4, %v1538_v1 }
 0x113   :  { %v714_v6 = vmax.f32 %v682_v2, 0.0  ;;  %v683_v7 = vadd.f32 %v1468_v3, %v2134_v10 }
 0x115   :  { %v715_v8 = vmax.f32 %v683_v7, 0.0  ;;  %v1469_v9 = vpop.f32.mrb[16].mxu0  ;;  %1630 = vmatprep.mubr.f32.mxu1 %v714_v6 }
 0x116   :  { %v1470_v11 = vpop.f32.mrb[17].mxu0 }
 0x117   :  { %v1471_v12 = vadd.f32 %v1470_v11, %v1469_v9  ;;  %v1472_v13 = vpop.f32.mrb[18].mxu0  ;;  %1631 = vmatmul.mubr.f32.gmra.mrb[22].mxu1 %v715_v8 }
 0x118   :  { %v1473_v14 = vpop.f32.mrb[19].mxu0 }
 0x119   :  { %v684_v15 = vadd.f32 %v1471_v12, %v2134_v10  ;;  %v1474_v17 = vadd.f32 %v1473_v14, %v1472_v13 }
 0x11b   :  { %v716_v18 = vmax.f32 %v684_v15, 0.0  ;;  %v685_v19 = vadd.f32 %v1474_v17, %v2134_v10 }
 0x11d   :  { %v717_v20 = vmax.f32 %v685_v19, 0.0  ;;  %v1475_v22 = vpop.f32.mrb[20].mxu0  ;;  %1633 = vmatprep.mubr.f32.mxu1 %v716_v18 }
 0x11e   :  { %v1476_v23 = vpop.f32.mrb[21].mxu0 }
 0x11f   :  { %v1477_v24 = vadd.f32 %v1476_v23, %v1475_v22  ;;  %v1478_v25 = vpop.f32.mrb[22].mxu0  ;;  %1634 = vmatmul.mubr.f32.gmra.mrb[24].mxu1 %v717_v20 }
 0x120   :  { %v1479_v26 = vpop.f32.mrb[23].mxu0 }
 0x121   :  { %v686_v27 = vadd.f32 %v1477_v24, %v2134_v10  ;;  %v1480_v28 = vadd.f32 %v1479_v26, %v1478_v25 }
 0x123   :  { %v718_v29 = vmax.f32 %v686_v27, 0.0  ;;  %v687_v30 = vadd.f32 %v1480_v28, %v2134_v10 }
 0x125   :  { %v719_v31 = vmax.f32 %v687_v30, 0.0  ;;  %v1481_v33 = vpop.f32.mrb[24].mxu0  ;;  %1636 = vmatprep.mubr.f32.mxu1 %v718_v29 }
 0x126   :  { %v1482_v34 = vpop.f32.mrb[25].mxu0 }
 0x127   :  { %v1483_v35 = vadd.f32 %v1482_v34, %v1481_v33  ;;  %v1484_v36 = vpop.f32.mrb[26].mxu0  ;;  %1637 = vmatmul.mubr.f32.gmra.mrb[26].mxu1 %v719_v31 }
 0x128   :  { %v1485_v38 = vpop.f32.mrb[27].mxu0 }
 0x129   :  { %v688_v39 = vadd.f32 %v1483_v35, %v2134_v10  ;;  %v1486_v40 = vadd.f32 %v1485_v38, %v1484_v36  ;;  %v700_v35 = vadd.f32 %v2136_v16, %v2134_v10  ;;  %v704_v16 = vadd.f32 %v2148_v48, %v2134_v10 }
 0x12b   :  { %v720_v41 = vmax.f32 %v688_v39, 0.0  ;;  %v689_v42 = vadd.f32 %v1486_v40, %v2134_v10  ;;  %v701_v39 = vadd.f32 %v2139_v21, %v2134_v10  ;;  %v706_v21 = vadd.f32 %v2154_v0, %v2134_v10  ;;  %v2197_v0 = vld [vmem:[%s2652_s4] ss:$0 sm:$0xff] }
 0x12d   :  { %v721_v43 = vmax.f32 %v689_v42, 0.0  ;;  %v1487_v44 = vpop.f32.mrb[28].mxu0  ;;  %1639 = vmatprep.mubr.f32.mxu1 %v720_v41  ;;  %v732_v41 = vmax.f32 %v700_v35, 0.0  ;;  %v702_v42 = vadd.f32 %v2142_v32, %v2134_v10  ;;  %v736_v32 = vmax.f32 %v704_v16, 0.0 }
 0x12e   :  { %v1488_v45 = vpop.f32.mrb[29].mxu0 }
 0x12f   :  { %v1489_v46 = vadd.f32 %v1488_v45, %v1487_v44  ;;  %v1490_v47 = vpop.f32.mrb[30].mxu0  ;;  %1640 = vmatmul.mubr.f32.gmra.mrb[28].mxu1 %v721_v43  ;;  %v733_v43 = vmax.f32 %v701_v39, 0.0  ;;  %v703_v44 = vadd.f32 %v2145_v37, %v2134_v10  ;;  %v734_v45 = vmax.f32 %v702_v42, 0.0 }
 0x130   :  { %v1491_v49 = vpop.f32.mrb[31].mxu0  ;;  %v707_v37 = vadd.f32 %v2157_v5, %v2134_v10 }
 0x131   :  { %v690_v50 = vadd.f32 %v1489_v46, %v2134_v10  ;;  %v1492_v51 = vadd.f32 %v1491_v49, %v1490_v47  ;;  %v735_v46 = vmax.f32 %v703_v44, 0.0  ;;  %v705_v47 = vadd.f32 %v2151_v53, %v2134_v10 }
 0x132   :  { %v738_v49 = vmax.f32 %v706_v21, 0.0  ;;  %v739_v48 = vmax.f32 %v707_v37, 0.0 }
 0x133   :  { %v722_v52 = vmax.f32 %v690_v50, 0.0  ;;  %v691_v54 = vadd.f32 %v1492_v51, %v2134_v10  ;;  %v737_v50 = vmax.f32 %v705_v47, 0.0  ;;  %v988_v51 = vlaneseq }
 0x135   :  { %v723_v55 = vmax.f32 %v691_v54, 0.0  ;;  %v1493_v56 = vpop.f32.mrb[32].mxu0  ;;  %1642 = vmatprep.mubr.f32.mxu1 %v722_v52  ;;  %v2192_v52 = vand.u32 127, %v988_v51 }
 0x136   :  { %v1494_v57 = vpop.f32.mrb[33].mxu0 }
 0x137   :  { %v1495_v58 = vadd.f32 %v1494_v57, %v1493_v56  ;;  %v1496_v59 = vpop.f32.mrb[34].mxu0  ;;  %1643 = vmatmul.mubr.f32.gmra.mrb[30].mxu1 %v723_v55  ;;  %vm990_vm0 = vcmp.lt.s32.totalorder %v2192_v52, 8 }
 0x138   :  { %v1497_v60 = vpop.f32.mrb[35].mxu0 }
 0x139   :  { %v692_v61 = vadd.f32 %v1495_v58, %v2134_v10  ;;  %v1498_v62 = vadd.f32 %v1497_v60, %v1496_v59 }
 0x13b   :  { %v724_v63 = vmax.f32 %v692_v61, 0.0  ;;  %v693_v1 = vadd.f32 %v1498_v62, %v2134_v10 }
 0x13d   :  { %v725_v2 = vmax.f32 %v693_v1, 0.0  ;;  %v1499_v3 = vpop.f32.mrb[36].mxu0  ;;  %1645 = vmatprep.mubr.f32.mxu1 %v724_v63 }
 0x13e   :  { %v1500_v4 = vpop.f32.mrb[37].mxu0 }
 0x13f   :  { %v1501_v6 = vadd.f32 %v1500_v4, %v1499_v3  ;;  %v1502_v7 = vpop.f32.mrb[38].mxu0  ;;  %1646 = vmatmul.mubr.f32.gmra.mrb[32].mxu1 %v725_v2 }
 0x140   :  { %v1503_v8 = vpop.f32.mrb[39].mxu0 }
 0x141   :  { %v694_v9 = vadd.f32 %v1501_v6, %v2134_v10  ;;  %v1504_v11 = vadd.f32 %v1503_v8, %v1502_v7 }
 0x143   :  { %v726_v12 = vmax.f32 %v694_v9, 0.0  ;;  %v695_v13 = vadd.f32 %v1504_v11, %v2134_v10 }
 0x145   :  { %v727_v14 = vmax.f32 %v695_v13, 0.0  ;;  %v1505_v15 = vpop.f32.mrb[40].mxu0  ;;  %1648 = vmatprep.mubr.f32.mxu1 %v726_v12 }
 0x146   :  { %v1506_v17 = vpop.f32.mrb[41].mxu0 }
 0x147   :  { %v1507_v18 = vadd.f32 %v1506_v17, %v1505_v15  ;;  %v1508_v19 = vpop.f32.mrb[42].mxu0  ;;  %1649 = vmatmul.mubr.f32.gmra.mrb[34].mxu1 %v727_v14 }
 0x148   :  { %v1509_v20 = vpop.f32.mrb[43].mxu0 }
 0x149   :  { %v696_v22 = vadd.f32 %v1507_v18, %v2134_v10  ;;  %v1510_v23 = vadd.f32 %v1509_v20, %v1508_v19 }
 0x14b   :  { %v728_v24 = vmax.f32 %v696_v22, 0.0  ;;  %v697_v25 = vadd.f32 %v1510_v23, %v2134_v10 }
 0x14d   :  { %v729_v26 = vmax.f32 %v697_v25, 0.0  ;;  %v1511_v27 = vpop.f32.mrb[44].mxu0  ;;  %1651 = vmatprep.mubr.f32.mxu1 %v728_v24 }
 0x14e   :  { %v1512_v28 = vpop.f32.mrb[45].mxu0 }
 0x14f   :  { %v1513_v29 = vadd.f32 %v1512_v28, %v1511_v27  ;;  %v1514_v30 = vpop.f32.mrb[46].mxu0  ;;  %1652 = vmatmul.mubr.f32.gmra.mrb[36].mxu1 %v729_v26 }
 0x150   :  { %v1515_v31 = vpop.f32.mrb[47].mxu0 }
 0x151   :  { %v698_v33 = vadd.f32 %v1513_v29, %v2134_v10  ;;  %v1516_v34 = vadd.f32 %v1515_v31, %v1514_v30 }
 0x153   :  { %v730_v36 = vmax.f32 %v698_v33, 0.0  ;;  %v699_v38 = vadd.f32 %v1516_v34, %v2134_v10 }
 0x155   :  { %v731_v40 = vmax.f32 %v699_v38, 0.0  ;;  %1654 = vmatprep.mubr.f32.mxu1 %v730_v36 }
 0x157   :  { %1655 = vmatmul.mubr.f32.gmra.mrb[38].mxu1 %v731_v40 }
 0x158   :  { %1657 = vmatprep.mubr.f32.mxu1 %v732_v41 }
 0x15b   :  { %1658 = vmatmul.mubr.f32.gmra.mrb[40].mxu1 %v733_v43 }
 0x15c   :  { %1660 = vmatprep.mubr.f32.mxu1 %v734_v45 }
 0x15f   :  { %1661 = vmatmul.mubr.f32.gmra.mrb[42].mxu1 %v735_v46 }
 0x160   :  { %1663 = vmatprep.mubr.f32.mxu1 %v736_v32 }
 0x163   :  { %1664 = vmatmul.mubr.f32.gmra.mrb[44].mxu1 %v737_v50 }
 0x164   :  { %1666 = vmatprep.mubr.f32.mxu1 %v738_v49 }
 0x167   :  { %1667 = vmatmul.mubr.f32.gmra.mrb[46].mxu1 %v739_v48 }
 0x1d2   :  { %v1623_v53 = vpop.f32.mrb[16].mxu1 }
 0x1d3   :  { %v835_v54 = vadd.f32 %v1623_v53, %v2197_v0  ;;  %v829_v55 = vpop.f32.mrb[17].mxu1 }
 0x1d4   :  { %v830_v10 = vadd.f32 %v2197_v0, %v829_v55 }
 0x1d5   :  { %v2204_v5 = vsel %vm990_vm0, %v835_v54, -1e+30 }
 0x1d6   :  { %1025 = vmax.xlane.f32.xlu0 %v2204_v5  ;;  %v2209_v56 = vsel %vm990_vm0, %v830_v10, -1e+30 }
 0x1da   :  { %v1626_v57 = vpop.f32.mrb[18].mxu1  ;;  %1023 = vmax.xlane.f32.xlu0 %v2209_v56 }
 0x1db   :  { %v845_v58 = vadd.f32 %v1626_v57, %v2197_v0  ;;  %v839_v59 = vpop.f32.mrb[19].mxu1 }
 0x1dc   :  { %v840_v60 = vadd.f32 %v2197_v0, %v839_v59 }
 0x1dd   :  { %v2216_v61 = vsel %vm990_vm0, %v845_v58, -1e+30 }
 0x1de   :  { %1029 = vmax.xlane.f32.xlu1 %v2216_v61  ;;  %v2221_v62 = vsel %vm990_vm0, %v840_v60, -1e+30 }
 0x1e2   :  { %v1629_v63 = vpop.f32.mrb[20].mxu1  ;;  %1027 = vmax.xlane.f32.xlu1 %v2221_v62 }
 0x1e3   :  { %v855_v1 = vadd.f32 %v1629_v63, %v2197_v0  ;;  %v849_v2 = vpop.f32.mrb[21].mxu1 }
 0x1e4   :  { %v850_v3 = vadd.f32 %v2197_v0, %v849_v2 }
 0x1e5   :  { %v2228_v4 = vsel %vm990_vm0, %v855_v1, -1e+30 }
 0x1e6   :  { %1033 = vmax.xlane.f32.xlu1 %v2228_v4  ;;  %v2233_v6 = vsel %vm990_vm0, %v850_v3, -1e+30 }
 0x1e7   :  { %1031 = vmax.xlane.f32.xlu0 %v2233_v6 }
 0x1ea   :  { %v1632_v7 = vpop.f32.mrb[22].mxu1 }
 0x1eb   :  { %v865_v8 = vadd.f32 %v1632_v7, %v2197_v0  ;;  %v859_v9 = vpop.f32.mrb[23].mxu1 }
 0x1ec   :  { %v860_v11 = vadd.f32 %v2197_v0, %v859_v9 }
 0x1ed   :  { %v2240_v12 = vsel %vm990_vm0, %v865_v8, -1e+30 }
 0x1ee   :  { %1037 = vmax.xlane.f32.xlu1 %v2240_v12  ;;  %v2245_v13 = vsel %vm990_vm0, %v860_v11, -1e+30 }
 0x1ef   :  { %1035 = vmax.xlane.f32.xlu0 %v2245_v13 }
 0x1f2   :  { %v1635_v14 = vpop.f32.mrb[24].mxu1 }
 0x1f3   :  { %v875_v15 = vadd.f32 %v1635_v14, %v2197_v0  ;;  %v869_v17 = vpop.f32.mrb[25].mxu1 }
 0x1f4   :  { %v870_v18 = vadd.f32 %v2197_v0, %v869_v17 }
 0x1f5   :  { %v2252_v19 = vsel %vm990_vm0, %v875_v15, -1e+30 }
 0x1f6   :  { %1041 = vmax.xlane.f32.xlu1 %v2252_v19  ;;  %v2257_v20 = vsel %vm990_vm0, %v870_v18, -1e+30 }
 0x1f7   :  { %1039 = vmax.xlane.f32.xlu0 %v2257_v20 }
 0x1fa   :  { %v1638_v22 = vpop.f32.mrb[26].mxu1 }
 0x1fb   :  { %v885_v23 = vadd.f32 %v1638_v22, %v2197_v0  ;;  %v879_v24 = vpop.f32.mrb[27].mxu1 }
 0x1fc   :  { %v880_v25 = vadd.f32 %v2197_v0, %v879_v24 }
 0x1fd   :  { %v2264_v26 = vsel %vm990_vm0, %v885_v23, -1e+30 }
 0x1fe   :  { %1045 = vmax.xlane.f32.xlu1 %v2264_v26  ;;  %v2269_v27 = vsel %vm990_vm0, %v880_v25, -1e+30 }
 0x1ff   :  { %1043 = vmax.xlane.f32.xlu0 %v2269_v27 }
 0x202   :  { %v1641_v28 = vpop.f32.mrb[28].mxu1 }
 0x203   :  { %v895_v29 = vadd.f32 %v1641_v28, %v2197_v0  ;;  %v889_v30 = vpop.f32.mrb[29].mxu1 }
 0x204   :  { %v890_v31 = vadd.f32 %v2197_v0, %v889_v30 }
 0x205   :  { %v2276_v33 = vsel %vm990_vm0, %v895_v29, -1e+30 }
 0x206   :  { %1049 = vmax.xlane.f32.xlu1 %v2276_v33  ;;  %v2281_v34 = vsel %vm990_vm0, %v890_v31, -1e+30 }
 0x207   :  { %1047 = vmax.xlane.f32.xlu0 %v2281_v34 }
 0x20a   :  { %v1644_v35 = vpop.f32.mrb[30].mxu1 }
 0x20b   :  { %v905_v36 = vadd.f32 %v1644_v35, %v2197_v0  ;;  %v899_v38 = vpop.f32.mrb[31].mxu1 }
 0x20c   :  { %v900_v39 = vadd.f32 %v2197_v0, %v899_v38 }
 0x20d   :  { %v2288_v40 = vsel %vm990_vm0, %v905_v36, -1e+30 }
 0x20e   :  { %1053 = vmax.xlane.f32.xlu1 %v2288_v40  ;;  %v2293_v41 = vsel %vm990_vm0, %v900_v39, -1e+30 }
 0x20f   :  { %1051 = vmax.xlane.f32.xlu0 %v2293_v41 }
 0x212   :  { %v1647_v42 = vpop.f32.mrb[32].mxu1 }
 0x213   :  { %v915_v43 = vadd.f32 %v1647_v42, %v2197_v0  ;;  %v909_v44 = vpop.f32.mrb[33].mxu1 }
 0x214   :  { %v910_v45 = vadd.f32 %v2197_v0, %v909_v44 }
 0x215   :  { %v2300_v16 = vsel %vm990_vm0, %v915_v43, -1e+30 }
 0x216   :  { %1057 = vmax.xlane.f32.xlu1 %v2300_v16  ;;  %v2305_v21 = vsel %vm990_vm0, %v910_v45, -1e+30 }
 0x217   :  { %1055 = vmax.xlane.f32.xlu0 %v2305_v21 }
 0x21a   :  { %v1650_v46 = vpop.f32.mrb[34].mxu1 }
 0x21b   :  { %v925_v47 = vadd.f32 %v1650_v46, %v2197_v0  ;;  %v919_v32 = vpop.f32.mrb[35].mxu1 }
 0x21c   :  { %v920_v49 = vadd.f32 %v2197_v0, %v919_v32 }
 0x21d   :  { %v2312_v50 = vsel %vm990_vm0, %v925_v47, -1e+30 }
 0x21e   :  { %1061 = vmax.xlane.f32.xlu1 %v2312_v50  ;;  %v2317_v37 = vsel %vm990_vm0, %v920_v49, -1e+30 }
 0x21f   :  { %1059 = vmax.xlane.f32.xlu0 %v2317_v37 }
 0x222   :  { %v1653_v48 = vpop.f32.mrb[36].mxu1 }
 0x223   :  { %v935_v51 = vadd.f32 %v1653_v48, %v2197_v0  ;;  %v929_v53 = vpop.f32.mrb[37].mxu1 }
 0x224   :  { %v930_v54 = vadd.f32 %v2197_v0, %v929_v53 }
 0x225   :  { %v2324_v55 = vsel %vm990_vm0, %v935_v51, -1e+30 }
 0x226   :  { %1065 = vmax.xlane.f32.xlu1 %v2324_v55  ;;  %v2329_v10 = vsel %vm990_vm0, %v930_v54, -1e+30 }
 0x227   :  { %1063 = vmax.xlane.f32.xlu0 %v2329_v10 }
 0x22a   :  { %v1656_v57 = vpop.f32.mrb[38].mxu1 }
 0x22b   :  { %v945_v58 = vadd.f32 %v1656_v57, %v2197_v0  ;;  %v939_v59 = vpop.f32.mrb[39].mxu1 }
 0x22c   :  { %v940_v60 = vadd.f32 %v2197_v0, %v939_v59 }
 0x22d   :  { %v2336_v63 = vsel %vm990_vm0, %v945_v58, -1e+30 }
 0x22e   :  { %v1659_v1 = vpop.f32.mrb[40].mxu1  ;;  %1069 = vmax.xlane.f32.xlu1 %v2336_v63  ;;  %v2341_v2 = vsel %vm990_vm0, %v940_v60, -1e+30 }
 0x22f   :  { %v955_v3 = vadd.f32 %v1659_v1, %v2197_v0  ;;  %v949_v7 = vpop.f32.mrb[41].mxu1  ;;  %1067 = vmax.xlane.f32.xlu0 %v2341_v2 }
 0x230   :  { %v950_v8 = vadd.f32 %v2197_v0, %v949_v7 }
 0x231   :  { %v2348_v9 = vsel %vm990_vm0, %v955_v3, -1e+30 }
 0x232   :  { %v1662_v11 = vpop.f32.mrb[42].mxu1  ;;  %1073 = vmax.xlane.f32.xlu1 %v2348_v9  ;;  %v2353_v14 = vsel %vm990_vm0, %v950_v8, -1e+30 }
 0x233   :  { %v965_v15 = vadd.f32 %v1662_v11, %v2197_v0  ;;  %v959_v17 = vpop.f32.mrb[43].mxu1  ;;  %1071 = vmax.xlane.f32.xlu0 %v2353_v14 }
 0x234   :  { %v960_v18 = vadd.f32 %v2197_v0, %v959_v17 }
 0x235   :  { %v2360_v22 = vsel %vm990_vm0, %v965_v15, -1e+30 }
 0x236   :  { %v1665_v23 = vpop.f32.mrb[44].mxu1  ;;  %1077 = vmax.xlane.f32.xlu1 %v2360_v22  ;;  %v2365_v24 = vsel %vm990_vm0, %v960_v18, -1e+30 }
 0x237   :  { %v975_v25 = vadd.f32 %v1665_v23, %v2197_v0  ;;  %v969_v28 = vpop.f32.mrb[45].mxu1  ;;  %1075 = vmax.xlane.f32.xlu0 %v2365_v24 }
 0x238   :  { %v970_v29 = vadd.f32 %v2197_v0, %v969_v28 }
 0x239   :  { %v2372_v30 = vsel %vm990_vm0, %v975_v25, -1e+30 }
 0x23a   :  { %v1668_v31 = vpop.f32.mrb[46].mxu1  ;;  %1081 = vmax.xlane.f32.xlu1 %v2372_v30  ;;  %v2377_v35 = vsel %vm990_vm0, %v970_v29, -1e+30 }
 0x23b   :  { %v985_v36 = vadd.f32 %v1668_v31, %v2197_v0  ;;  %v979_v38 = vpop.f32.mrb[47].mxu1  ;;  %1079 = vmax.xlane.f32.xlu0 %v2377_v35 }
 0x23c   :  { %v980_v39 = vadd.f32 %v2197_v0, %v979_v38 }
 0x23d   :  { %v2384_v42 = vsel %vm990_vm0, %v985_v36, -1e+30 }
 0x23e   :  { %1085 = vmax.xlane.f32.xlu1 %v2384_v42  ;;  %v2389_v43 = vsel %vm990_vm0, %v980_v39, -1e+30 }
 0x23f   :  { %1083 = vmax.xlane.f32.xlu0 %v2389_v43 }
 0x263   :  { %v1026_v44 = vpop.xlane.xlu0 %1025 }
 0x264   :  { %v2393_v45 = vsub.f32 %v2204_v5, %v1026_v44 }
 0x266   :  { %v1121_v46 = vmul.f32 1.442695, %v2393_v45 }
 0x267   :  { %v1024_v47 = vpop.xlane.xlu0 %1023 }
 0x268   :  { %1781 = vpow2.f32 %v1121_v46  ;;  %v2397_v0 = vsub.f32 %v2209_v56, %v1024_v47 }
 0x26a   :  { %v1119_v32 = vmul.f32 1.442695, %v2397_v0 }
 0x26b   :  { %v1030_v49 = vpop.xlane.xlu1 %1029 }
 0x26c   :  { %1783 = vpow2.f32 %v1119_v32  ;;  %v2401_v52 = vsub.f32 %v2216_v61, %v1030_v49 }
 0x26e   :  { %v1125_v48 = vmul.f32 1.442695, %v2401_v52 }
 0x26f   :  { %v1028_v51 = vpop.xlane.xlu1 %1027 }
 0x270   :  { %1785 = vpow2.f32 %v1125_v48  ;;  %v2405_v5 = vsub.f32 %v2221_v62, %v1028_v51 }
 0x272   :  { %v1782_v53 = vpop.eup %1781  ;;  %v1123_v54 = vmul.f32 1.442695, %v2405_v5 }
 0x273   :  { %1185 = vadd.xlane.f32.xlu1 %v1782_v53  ;;  %v1034_v56 = vpop.xlane.xlu1 %1033 }
 0x274   :  { %1787 = vpow2.f32 %v1123_v54  ;;  %v2409_v57 = vsub.f32 %v2228_v4, %v1034_v56  ;;  %v1032_v58 = vpop.xlane.xlu0 %1031 }
 0x275   :  { %v2412_v61 = vsub.f32 %v2233_v6, %v1032_v58 }
 0x276   :  { %v1784_v59 = vpop.eup %1783  ;;  %v1129_v60 = vmul.f32 1.442695, %v2409_v57 }
 0x277   :  { %v1127_v1 = vmul.f32 1.442695, %v2412_v61  ;;  %1183 = vadd.xlane.f32.xlu0 %v1784_v59 }
 0x278   :  { %1789 = vpow2.f32 %v1129_v60 }
 0x279   :  { %1791 = vpow2.f32 %v1127_v1 }
 0x27a   :  { %v1786_v62 = vpop.eup %1785 }
 0x27b   :  { %1189 = vadd.xlane.f32.xlu1 %v1786_v62  ;;  %v1038_v3 = vpop.xlane.xlu1 %1037 }
 0x27c   :  { %v2417_v7 = vsub.f32 %v2240_v12, %v1038_v3  ;;  %v1036_v4 = vpop.xlane.xlu0 %1035 }
 0x27d   :  { %v2420_v8 = vsub.f32 %v2245_v13, %v1036_v4 }
 0x27e   :  { %v1788_v6 = vpop.eup %1787  ;;  %v1133_v11 = vmul.f32 1.442695, %v2417_v7 }
 0x27f   :  { %v1131_v15 = vmul.f32 1.442695, %v2420_v8  ;;  %1187 = vadd.xlane.f32.xlu0 %v1788_v6 }
 0x280   :  { %1793 = vpow2.f32 %v1133_v11 }
 0x281   :  { %1795 = vpow2.f32 %v1131_v15 }
 0x282   :  { %v1790_v17 = vpop.eup %1789 }
 0x283   :  { %v1792_v18 = vpop.eup %1791  ;;  %1193 = vadd.xlane.f32.xlu1 %v1790_v17  ;;  %v1042_v23 = vpop.xlane.xlu1 %1041 }
 0x284   :  { %v2425_v25 = vsub.f32 %v2252_v19, %v1042_v23  ;;  %1191 = vadd.xlane.f32.xlu0 %v1792_v18  ;;  %v1040_v12 = vpop.xlane.xlu0 %1039 }
 0x285   :  { %v2428_v13 = vsub.f32 %v2257_v20, %v1040_v12 }
 0x286   :  { %v1137_v28 = vmul.f32 1.442695, %v2425_v25 }
 0x287   :  { %v1135_v29 = vmul.f32 1.442695, %v2428_v13 }
 0x288   :  { %1797 = vpow2.f32 %v1137_v28 }
 0x289   :  { %1799 = vpow2.f32 %v1135_v29 }
 0x28a   :  { %v1794_v31 = vpop.eup %1793 }
 0x28b   :  { %v1796_v36 = vpop.eup %1795  ;;  %1197 = vadd.xlane.f32.xlu1 %v1794_v31  ;;  %v1046_v38 = vpop.xlane.xlu1 %1045 }
 0x28c   :  { %v2433_v39 = vsub.f32 %v2264_v26, %v1046_v38  ;;  %1195 = vadd.xlane.f32.xlu0 %v1796_v36  ;;  %v1044_v19 = vpop.xlane.xlu0 %1043 }
 0x28d   :  { %v2436_v44 = vsub.f32 %v2269_v27, %v1044_v19 }
 0x28e   :  { %v1141_v20 = vmul.f32 1.442695, %v2433_v39 }
 0x28f   :  { %v1139_v46 = vmul.f32 1.442695, %v2436_v44 }
 0x290   :  { %1801 = vpow2.f32 %v1141_v20 }
 0x291   :  { %1803 = vpow2.f32 %v1139_v46 }
 0x292   :  { %v1798_v47 = vpop.eup %1797 }
 0x293   :  { %v1800_v32 = vpop.eup %1799  ;;  %1201 = vadd.xlane.f32.xlu1 %v1798_v47  ;;  %v1050_v49 = vpop.xlane.xlu1 %1049 }
 0x294   :  { %v2441_v48 = vsub.f32 %v2276_v33, %v1050_v49  ;;  %1199 = vadd.xlane.f32.xlu0 %v1800_v32  ;;  %v1048_v26 = vpop.xlane.xlu0 %1047 }
 0x295   :  { %v2444_v51 = vsub.f32 %v2281_v34, %v1048_v26 }
 0x296   :  { %v1145_v27 = vmul.f32 1.442695, %v2441_v48 }
 0x297   :  { %v1143_v53 = vmul.f32 1.442695, %v2444_v51 }
 0x298   :  { %1805 = vpow2.f32 %v1145_v27 }
 0x299   :  { %1807 = vpow2.f32 %v1143_v53 }
 0x29a   :  { %v1802_v54 = vpop.eup %1801 }
 0x29b   :  { %v1804_v56 = vpop.eup %1803  ;;  %1205 = vadd.xlane.f32.xlu1 %v1802_v54  ;;  %v1054_v58 = vpop.xlane.xlu1 %1053 }
 0x29c   :  { %v2449_v59 = vsub.f32 %v2288_v40, %v1054_v58  ;;  %1203 = vadd.xlane.f32.xlu0 %v1804_v56  ;;  %v1052_v33 = vpop.xlane.xlu0 %1051 }
 0x29d   :  { %v2452_v60 = vsub.f32 %v2293_v41, %v1052_v33 }
 0x29e   :  { %v1149_v34 = vmul.f32 1.442695, %v2449_v59 }
 0x29f   :  { %v1147_v1 = vmul.f32 1.442695, %v2452_v60 }
 0x2a0   :  { %1809 = vpow2.f32 %v1149_v34 }
 0x2a1   :  { %1811 = vpow2.f32 %v1147_v1 }
 0x2a2   :  { %v1806_v62 = vpop.eup %1805 }
 0x2a3   :  { %v1808_v3 = vpop.eup %1807  ;;  %1209 = vadd.xlane.f32.xlu1 %v1806_v62  ;;  %v1058_v4 = vpop.xlane.xlu1 %1057 }
 0x2a4   :  { %v2457_v6 = vsub.f32 %v2300_v16, %v1058_v4  ;;  %1207 = vadd.xlane.f32.xlu0 %v1808_v3  ;;  %v1056_v40 = vpop.xlane.xlu0 %1055 }
 0x2a5   :  { %v2460_v11 = vsub.f32 %v2305_v21, %v1056_v40 }
 0x2a6   :  { %v1153_v41 = vmul.f32 1.442695, %v2457_v6 }
 0x2a7   :  { %v1151_v15 = vmul.f32 1.442695, %v2460_v11 }
 0x2a8   :  { %1813 = vpow2.f32 %v1153_v41 }
 0x2a9   :  { %1815 = vpow2.f32 %v1151_v15 }
 0x2aa   :  { %v1810_v17 = vpop.eup %1809 }
 0x2ab   :  { %v1812_v18 = vpop.eup %1811  ;;  %1213 = vadd.xlane.f32.xlu1 %v1810_v17  ;;  %v1062_v23 = vpop.xlane.xlu1 %1061 }
 0x2ac   :  { %v2465_v12 = vsub.f32 %v2312_v50, %v1062_v23  ;;  %1211 = vadd.xlane.f32.xlu0 %v1812_v18  ;;  %v1060_v16 = vpop.xlane.xlu0 %1059 }
 0x2ad   :  { %v2468_v28 = vsub.f32 %v2317_v37, %v1060_v16 }
 0x2ae   :  { %v1157_v21 = vmul.f32 1.442695, %v2465_v12 }
 0x2af   :  { %v1155_v29 = vmul.f32 1.442695, %v2468_v28 }
 0x2b0   :  { %1817 = vpow2.f32 %v1157_v21 }
 0x2b1   :  { %1819 = vpow2.f32 %v1155_v29 }
 0x2b2   :  { %v1814_v31 = vpop.eup %1813 }
 0x2b3   :  { %v1816_v36 = vpop.eup %1815  ;;  %1217 = vadd.xlane.f32.xlu1 %v1814_v31  ;;  %v1066_v38 = vpop.xlane.xlu1 %1065 }
 0x2b4   :  { %v2473_v19 = vsub.f32 %v2324_v55, %v1066_v38  ;;  %1215 = vadd.xlane.f32.xlu0 %v1816_v36  ;;  %v1064_v50 = vpop.xlane.xlu0 %1063 }
 0x2b5   :  { %v2476_v20 = vsub.f32 %v2329_v10, %v1064_v50 }
 0x2b6   :  { %v1161_v37 = vmul.f32 1.442695, %v2473_v19 }
 0x2b7   :  { %v1159_v46 = vmul.f32 1.442695, %v2476_v20 }
 0x2b8   :  { %1821 = vpow2.f32 %v1161_v37 }
 0x2b9   :  { %1823 = vpow2.f32 %v1159_v46 }
 0x2ba   :  { %v1818_v47 = vpop.eup %1817 }
 0x2bb   :  { %v1820_v32 = vpop.eup %1819  ;;  %1221 = vadd.xlane.f32.xlu1 %v1818_v47  ;;  %v1070_v49 = vpop.xlane.xlu1 %1069 }
 0x2bc   :  { %v2481_v26 = vsub.f32 %v2336_v63, %v1070_v49  ;;  %1219 = vadd.xlane.f32.xlu0 %v1820_v32  ;;  %v1068_v55 = vpop.xlane.xlu0 %1067 }
 0x2bd   :  { %v2484_v27 = vsub.f32 %v2341_v2, %v1068_v55 }
 0x2be   :  { %v1165_v10 = vmul.f32 1.442695, %v2481_v26 }
 0x2bf   :  { %v1163_v53 = vmul.f32 1.442695, %v2484_v27  ;;  %v1074_v54 = vpop.xlane.xlu1 %1073 }
 0x2c0   :  { %1825 = vpow2.f32 %v1165_v10  ;;  %v2489_v56 = vsub.f32 %v2348_v9, %v1074_v54  ;;  %v1072_v58 = vpop.xlane.xlu0 %1071 }
 0x2c1   :  { %1827 = vpow2.f32 %v1163_v53  ;;  %v2492_v33 = vsub.f32 %v2353_v14, %v1072_v58 }
 0x2c2   :  { %v1822_v63 = vpop.eup %1821  ;;  %v1169_v34 = vmul.f32 1.442695, %v2489_v56 }
 0x2c3   :  { %v1824_v1 = vpop.eup %1823  ;;  %v1167_v2 = vmul.f32 1.442695, %v2492_v33  ;;  %1225 = vadd.xlane.f32.xlu1 %v1822_v63  ;;  %v1078_v62 = vpop.xlane.xlu1 %1077 }
 0x2c4   :  { %1829 = vpow2.f32 %v1169_v34  ;;  %v2497_v3 = vsub.f32 %v2360_v22, %v1078_v62  ;;  %1223 = vadd.xlane.f32.xlu0 %v1824_v1  ;;  %v1076_v9 = vpop.xlane.xlu0 %1075 }
 0x2c5   :  { %1831 = vpow2.f32 %v1167_v2  ;;  %v2500_v4 = vsub.f32 %v2365_v24, %v1076_v9 }
 0x2c6   :  { %v1173_v14 = vmul.f32 1.442695, %v2497_v3 }
 0x2c7   :  { %v1171_v40 = vmul.f32 1.442695, %v2500_v4  ;;  %v1082_v41 = vpop.xlane.xlu1 %1081 }
 0x2c8   :  { %1833 = vpow2.f32 %v1173_v14  ;;  %v2505_v15 = vsub.f32 %v2372_v30, %v1082_v41  ;;  %v1080_v17 = vpop.xlane.xlu0 %1079 }
 0x2c9   :  { %1835 = vpow2.f32 %v1171_v40  ;;  %v2508_v22 = vsub.f32 %v2377_v35, %v1080_v17 }
 0x2ca   :  { %v1826_v18 = vpop.eup %1825  ;;  %v1177_v23 = vmul.f32 1.442695, %v2505_v15 }
 0x2cb   :  { %v1828_v16 = vpop.eup %1827  ;;  %v1175_v24 = vmul.f32 1.442695, %v2508_v22  ;;  %1229 = vadd.xlane.f32.xlu1 %v1826_v18  ;;  %v1086_v21 = vpop.xlane.xlu1 %1085 }
 0x2cc   :  { %1837 = vpow2.f32 %v1177_v23  ;;  %v2513_v29 = vsub.f32 %v2384_v42, %v1086_v21  ;;  %1227 = vadd.xlane.f32.xlu0 %v1828_v16  ;;  %v1084_v30 = vpop.xlane.xlu0 %1083 }
 0x2cd   :  { %1839 = vpow2.f32 %v1175_v24  ;;  %v2516_v31 = vsub.f32 %v2389_v43, %v1084_v30 }
 0x2ce   :  { %v1830_v35 = vpop.eup %1829  ;;  %v1181_v36 = vmul.f32 1.442695, %v2513_v29 }
 0x2cf   :  { %v1832_v38 = vpop.eup %1831  ;;  %v1179_v50 = vmul.f32 1.442695, %v2516_v31  ;;  %1233 = vadd.xlane.f32.xlu1 %v1830_v35 }
 0x2d0   :  { %1841 = vpow2.f32 %v1181_v36  ;;  %1231 = vadd.xlane.f32.xlu0 %v1832_v38 }
 0x2d1   :  { %1843 = vpow2.f32 %v1179_v50 }
 0x2d2   :  { %v1834_v37 = vpop.eup %1833 }
 0x2d3   :  { %v1836_v46 = vpop.eup %1835  ;;  %1237 = vadd.xlane.f32.xlu1 %v1834_v37 }
 0x2d4   :  { %1235 = vadd.xlane.f32.xlu0 %v1836_v46 }
 0x2d6   :  { %v1838_v42 = vpop.eup %1837 }
 0x2d7   :  { %v1840_v47 = vpop.eup %1839  ;;  %1241 = vadd.xlane.f32.xlu1 %v1838_v42 }
 0x2d8   :  { %1239 = vadd.xlane.f32.xlu0 %v1840_v47 }
 0x2da   :  { %v1842_v43 = vpop.eup %1841 }
 0x2db   :  { %v1844_v32 = vpop.eup %1843  ;;  %1245 = vadd.xlane.f32.xlu1 %v1842_v43 }
 0x2dc   :  { %1243 = vadd.xlane.f32.xlu0 %v1844_v32 }
 0x300   :  { %v1186_v49 = vpop.xlane.xlu1 %1185 }
 0x301   :  { %1845 = vlog2.f32 %v1186_v49 }
 0x304   :  { %v1184_v55 = vpop.xlane.xlu0 %1183 }
 0x305   :  { %1847 = vlog2.f32 %v1184_v55 }
 0x308   :  { %v1190_v10 = vpop.xlane.xlu1 %1189 }
 0x309   :  { %1849 = vlog2.f32 %v1190_v10 }
 0x30b   :  { %v1846_v53 = vpop.eup %1845 }
 0x30c   :  { %v1250_v54 = vmul.f32 0.6931472, %v1846_v53  ;;  %v1188_v58 = vpop.xlane.xlu0 %1187 }
 0x30d   :  { %1851 = vlog2.f32 %v1188_v58 }
 0x30e   :  { %v1312_v63 = vsub.f32 %v2393_v45, %v1250_v54 }
 0x30f   :  { %v1848_v34 = vpop.eup %1847 }
 0x310   :  { %1344 = vst [vmem:[%s2653_s5 + $0x8] sm:$0xff] %v1312_v63  ;;  %v1248_v1 = vmul.f32 0.6931472, %v1848_v34  ;;  %v1194_v2 = vpop.xlane.xlu1 %1193 }
 0x311   :  { %1853 = vlog2.f32 %v1194_v2  ;;  %v1192_v62 = vpop.xlane.xlu0 %1191 }
 0x312   :  { %v1311_v9 = vsub.f32 %v2397_v0, %v1248_v1  ;;  %1855 = vlog2.f32 %v1192_v62 }
 0x313   :  { %v1850_v14 = vpop.eup %1849 }
 0x314   :  { %1343 = vst [vmem:[%s2653_s5] sm:$0xff] %v1311_v9  ;;  %v1254_v40 = vmul.f32 0.6931472, %v1850_v14 }
 0x316   :  { %v1314_v45 = vsub.f32 %v2401_v52, %v1254_v40 }
 0x317   :  { %v1852_v41 = vpop.eup %1851 }
 0x318   :  { %1346 = vst [vmem:[%s2653_s5 + $0x18] sm:$0xff] %v1314_v45  ;;  %v1252_v17 = vmul.f32 0.6931472, %v1852_v41  ;;  %v1198_v18 = vpop.xlane.xlu1 %1197 }
 0x319   :  { %1857 = vlog2.f32 %v1198_v18  ;;  %v1196_v23 = vpop.xlane.xlu0 %1195 }
 0x31a   :  { %v1313_v0 = vsub.f32 %v2405_v5, %v1252_v17  ;;  %1859 = vlog2.f32 %v1196_v23 }
 0x31b   :  { %v1854_v16 = vpop.eup %1853 }
 0x31c   :  { %v1856_v24 = vpop.eup %1855  ;;  %1345 = vst [vmem:[%s2653_s5 + $0x10] sm:$0xff] %v1313_v0  ;;  %v1258_v21 = vmul.f32 0.6931472, %v1854_v16 }
 0x31d   :  { %v1256_v52 = vmul.f32 0.6931472, %v1856_v24 }
 0x31e   :  { %v1316_v30 = vsub.f32 %v2409_v57, %v1258_v21 }
 0x31f   :  { %v1315_v35 = vsub.f32 %v2412_v61, %v1256_v52 }
 0x320   :  { %1348 = vst [vmem:[%s2653_s5 + $0x28] sm:$0xff] %v1316_v30  ;;  %v1202_v36 = vpop.xlane.xlu1 %1201 }
 0x321   :  { %1347 = vst [vmem:[%s2653_s5 + $0x20] sm:$0xff] %v1315_v35  ;;  %1861 = vlog2.f32 %v1202_v36  ;;  %v1200_v5 = vpop.xlane.xlu0 %1199 }
 0x322   :  { %1863 = vlog2.f32 %v1200_v5 }
 0x323   :  { %v1858_v38 = vpop.eup %1857 }
 0x324   :  { %v1860_v50 = vpop.eup %1859  ;;  %v1262_v37 = vmul.f32 0.6931472, %v1858_v38 }
 0x325   :  { %v1260_v46 = vmul.f32 0.6931472, %v1860_v50 }
 0x326   :  { %v1318_v57 = vsub.f32 %v2417_v7, %v1262_v37 }
 0x327   :  { %v1317_v61 = vsub.f32 %v2420_v8, %v1260_v46 }
 0x328   :  { %1350 = vst [vmem:[%s2653_s5 + $0x38] sm:$0xff] %v1318_v57  ;;  %v1206_v42 = vpop.xlane.xlu1 %1205 }
 0x329   :  { %1349 = vst [vmem:[%s2653_s5 + $0x30] sm:$0xff] %v1317_v61  ;;  %1865 = vlog2.f32 %v1206_v42  ;;  %v1204_v47 = vpop.xlane.xlu0 %1203 }
 0x32a   :  { %1867 = vlog2.f32 %v1204_v47 }
 0x32b   :  { %v1862_v43 = vpop.eup %1861 }
 0x32c   :  { %v1864_v32 = vpop.eup %1863  ;;  %v1266_v49 = vmul.f32 0.6931472, %v1862_v43 }
 0x32d   :  { %v1264_v55 = vmul.f32 0.6931472, %v1864_v32 }
 0x32e   :  { %v1320_v7 = vsub.f32 %v2425_v25, %v1266_v49 }
 0x32f   :  { %v1319_v8 = vsub.f32 %v2428_v13, %v1264_v55 }
 0x330   :  { %1352 = vst [vmem:[%s2653_s5 + $0x48] sm:$0xff] %v1320_v7  ;;  %v1210_v10 = vpop.xlane.xlu1 %1209 }
 0x331   :  { %1351 = vst [vmem:[%s2653_s5 + $0x40] sm:$0xff] %v1319_v8  ;;  %1869 = vlog2.f32 %v1210_v10  ;;  %v1208_v53 = vpop.xlane.xlu0 %1207 }
 0x332   :  { %1871 = vlog2.f32 %v1208_v53 }
 0x333   :  { %v1866_v54 = vpop.eup %1865 }
 0x334   :  { %v1868_v58 = vpop.eup %1867  ;;  %v1270_v63 = vmul.f32 0.6931472, %v1866_v54 }
 0x335   :  { %v1268_v34 = vmul.f32 0.6931472, %v1868_v58 }
 0x336   :  { %v1322_v25 = vsub.f32 %v2433_v39, %v1270_v63 }
 0x337   :  { %v1321_v13 = vsub.f32 %v2436_v44, %v1268_v34 }
 0x338   :  { %1354 = vst [vmem:[%s2653_s5 + $0x58] sm:$0xff] %v1322_v25  ;;  %v1214_v1 = vpop.xlane.xlu1 %1213 }
 0x339   :  { %1353 = vst [vmem:[%s2653_s5 + $0x50] sm:$0xff] %v1321_v13  ;;  %1873 = vlog2.f32 %v1214_v1  ;;  %v1212_v2 = vpop.xlane.xlu0 %1211 }
 0x33a   :  { %1875 = vlog2.f32 %v1212_v2 }
 0x33b   :  { %v1870_v62 = vpop.eup %1869 }
 0x33c   :  { %v1872_v9 = vpop.eup %1871  ;;  %v1274_v14 = vmul.f32 0.6931472, %v1870_v62 }
 0x33d   :  { %v1272_v40 = vmul.f32 0.6931472, %v1872_v9 }
 0x33e   :  { %v1324_v39 = vsub.f32 %v2441_v48, %v1274_v14 }
 0x33f   :  { %v1323_v44 = vsub.f32 %v2444_v51, %v1272_v40 }
 0x340   :  { %1356 = vst [vmem:[%s2653_s5 + $0x68] sm:$0xff] %v1324_v39  ;;  %v1218_v45 = vpop.xlane.xlu1 %1217 }
 0x341   :  { %1355 = vst [vmem:[%s2653_s5 + $0x60] sm:$0xff] %v1323_v44  ;;  %1877 = vlog2.f32 %v1218_v45  ;;  %v1216_v41 = vpop.xlane.xlu0 %1215 }
 0x342   :  { %1879 = vlog2.f32 %v1216_v41 }
 0x343   :  { %v1874_v17 = vpop.eup %1873 }
 0x344   :  { %v1876_v18 = vpop.eup %1875  ;;  %v1278_v23 = vmul.f32 0.6931472, %v1874_v17 }
 0x345   :  { %v1276_v0 = vmul.f32 0.6931472, %v1876_v18 }
 0x346   :  { %v1326_v48 = vsub.f32 %v2449_v59, %v1278_v23 }
 0x347   :  { %v1325_v51 = vsub.f32 %v2452_v60, %v1276_v0 }
 0x348   :  { %1358 = vst [vmem:[%s2653_s5 + $0x78] sm:$0xff] %v1326_v48  ;;  %v1222_v16 = vpop.xlane.xlu1 %1221 }
 0x349   :  { %1357 = vst [vmem:[%s2653_s5 + $0x70] sm:$0xff] %v1325_v51  ;;  %1881 = vlog2.f32 %v1222_v16  ;;  %v1220_v24 = vpop.xlane.xlu0 %1219 }
 0x34a   :  { %1883 = vlog2.f32 %v1220_v24 }
 0x34b   :  { %v1878_v21 = vpop.eup %1877 }
 0x34c   :  { %v1880_v52 = vpop.eup %1879  ;;  %v1282_v30 = vmul.f32 0.6931472, %v1878_v21 }
 0x34d   :  { %v1280_v35 = vmul.f32 0.6931472, %v1880_v52 }
 0x34e   :  { %v1328_v59 = vsub.f32 %v2457_v6, %v1282_v30 }
 0x34f   :  { %v1327_v60 = vsub.f32 %v2460_v11, %v1280_v35 }
 0x350   :  { %1360 = vst [vmem:[%s2653_s5 + $0x88] sm:$0xff] %v1328_v59  ;;  %v1226_v36 = vpop.xlane.xlu1 %1225 }
 0x351   :  { %1359 = vst [vmem:[%s2653_s5 + $0x80] sm:$0xff] %v1327_v60  ;;  %1885 = vlog2.f32 %v1226_v36  ;;  %v1224_v5 = vpop.xlane.xlu0 %1223 }
 0x352   :  { %1887 = vlog2.f32 %v1224_v5 }
 0x353   :  { %v1882_v38 = vpop.eup %1881 }
 0x354   :  { %v1884_v50 = vpop.eup %1883  ;;  %v1286_v37 = vmul.f32 0.6931472, %v1882_v38 }
 0x355   :  { %v1284_v46 = vmul.f32 0.6931472, %v1884_v50 }
 0x356   :  { %v1330_v6 = vsub.f32 %v2465_v12, %v1286_v37 }
 0x357   :  { %v1329_v11 = vsub.f32 %v2468_v28, %v1284_v46 }
 0x358   :  { %1362 = vst [vmem:[%s2653_s5 + $0x98] sm:$0xff] %v1330_v6  ;;  %v1230_v57 = vpop.xlane.xlu1 %1229 }
 0x359   :  { %1361 = vst [vmem:[%s2653_s5 + $0x90] sm:$0xff] %v1329_v11  ;;  %1889 = vlog2.f32 %v1230_v57  ;;  %v1228_v61 = vpop.xlane.xlu0 %1227 }
 0x35a   :  { %1891 = vlog2.f32 %v1228_v61 }
 0x35b   :  { %v1886_v42 = vpop.eup %1885 }
 0x35c   :  { %v1888_v47 = vpop.eup %1887  ;;  %v1290_v43 = vmul.f32 0.6931472, %v1886_v42  ;;  %v1234_v32 = vpop.xlane.xlu1 %1233 }
 0x35d   :  { %v1288_v49 = vmul.f32 0.6931472, %v1888_v47  ;;  %1893 = vlog2.f32 %v1234_v32  ;;  %v1232_v12 = vpop.xlane.xlu0 %1231 }
 0x35e   :  { %v1332_v28 = vsub.f32 %v2473_v19, %v1290_v43  ;;  %1895 = vlog2.f32 %v1232_v12 }
 0x35f   :  { %v1331_v55 = vsub.f32 %v2476_v20, %v1288_v49 }
 0x360   :  { %1364 = vst [vmem:[%s2653_s5 + $0xa8] sm:$0xff] %v1332_v28  ;;  %v1238_v7 = vpop.xlane.xlu1 %1237 }
 0x361   :  { %1363 = vst [vmem:[%s2653_s5 + $0xa0] sm:$0xff] %v1331_v55  ;;  %1897 = vlog2.f32 %v1238_v7  ;;  %v1236_v8 = vpop.xlane.xlu0 %1235 }
 0x362   :  { %1899 = vlog2.f32 %v1236_v8 }
 0x363   :  { %v1890_v10 = vpop.eup %1889 }
 0x364   :  { %v1892_v53 = vpop.eup %1891  ;;  %v1294_v54 = vmul.f32 0.6931472, %v1890_v10  ;;  %v1242_v58 = vpop.xlane.xlu1 %1241 }
 0x365   :  { %v1292_v19 = vmul.f32 0.6931472, %v1892_v53  ;;  %1901 = vlog2.f32 %v1242_v58  ;;  %v1240_v63 = vpop.xlane.xlu0 %1239 }
 0x366   :  { %v1334_v20 = vsub.f32 %v2481_v26, %v1294_v54  ;;  %1903 = vlog2.f32 %v1240_v63 }
 0x367   :  { %v1894_v34 = vpop.eup %1893  ;;  %v1333_v25 = vsub.f32 %v2484_v27, %v1292_v19 }
 0x368   :  { %v1896_v13 = vpop.eup %1895  ;;  %1366 = vst [vmem:[%s2653_s5 + $0xb8] sm:$0xff] %v1334_v20  ;;  %v1298_v1 = vmul.f32 0.6931472, %v1894_v34  ;;  %v1246_v2 = vpop.xlane.xlu1 %1245 }
 0x369   :  { %1365 = vst [vmem:[%s2653_s5 + $0xb0] sm:$0xff] %v1333_v25  ;;  %v1296_v62 = vmul.f32 0.6931472, %v1896_v13  ;;  %1905 = vlog2.f32 %v1246_v2  ;;  %v1244_v9 = vpop.xlane.xlu0 %1243 }
 0x36a   :  { %v1336_v26 = vsub.f32 %v2489_v56, %v1298_v1  ;;  %1907 = vlog2.f32 %v1244_v9 }
 0x36b   :  { %v1898_v14 = vpop.eup %1897  ;;  %v1335_v27 = vsub.f32 %v2492_v33, %v1296_v62 }
 0x36c   :  { %v1900_v40 = vpop.eup %1899  ;;  %1368 = vst [vmem:[%s2653_s5 + $0xc8] sm:$0xff] %v1336_v26  ;;  %v1302_v39 = vmul.f32 0.6931472, %v1898_v14 }
 0x36d   :  { %1367 = vst [vmem:[%s2653_s5 + $0xc0] sm:$0xff] %v1335_v27  ;;  %v1300_v44 = vmul.f32 0.6931472, %v1900_v40 }
 0x36e   :  { %v1338_v45 = vsub.f32 %v2497_v3, %v1302_v39 }
 0x36f   :  { %v1902_v41 = vpop.eup %1901  ;;  %v1337_v56 = vsub.f32 %v2500_v4, %v1300_v44 }
 0x370   :  { %v1904_v17 = vpop.eup %1903  ;;  %1370 = vst [vmem:[%s2653_s5 + $0xd8] sm:$0xff] %v1338_v45  ;;  %v1306_v33 = vmul.f32 0.6931472, %v1902_v41 }
 0x371   :  { %1369 = vst [vmem:[%s2653_s5 + $0xd0] sm:$0xff] %v1337_v56  ;;  %v1304_v18 = vmul.f32 0.6931472, %v1904_v17 }
 0x372   :  { %v1340_v23 = vsub.f32 %v2505_v15, %v1306_v33 }
 0x373   :  { %v1906_v0 = vpop.eup %1905  ;;  %v1339_v48 = vsub.f32 %v2508_v22, %v1304_v18 }
 0x374   :  { %v1908_v3 = vpop.eup %1907  ;;  %1372 = vst [vmem:[%s2653_s5 + $0xe8] sm:$0xff] %v1340_v23  ;;  %v1310_v4 = vmul.f32 0.6931472, %v1906_v0 }
 0x375   :  { %1371 = vst [vmem:[%s2653_s5 + $0xe0] sm:$0xff] %v1339_v48  ;;  %v1308_v51 = vmul.f32 0.6931472, %v1908_v3 }
 0x376   :  { %v1342_v16 = vsub.f32 %v2513_v29, %v1310_v4 }
 0x377   :  { %v1341_v24 = vsub.f32 %v2516_v31, %v1308_v51 }
 0x378   :  { %1374 = vst [vmem:[%s2653_s5 + $0xf8] sm:$0xff] %v1342_v16 }
 0x379   :  { %1373 = vst [vmem:[%s2653_s5 + $0xf0] sm:$0xff] %v1341_v24 }

</bundles_post_ra>
